<compile_context>
chip_gen: v7x
topology: tpu7x:2x2x1
jax: 0.10.0
libtpu: 0.0.40
codegen_flags: <defaults>
</compile_context>

<pallas_src>
import functools
import math

import jax
import jax.numpy as jnp
import numpy as np
from jax.experimental import pallas as pl
from jax.experimental.pallas import tpu as pltpu

# ---------------- small, shape-consistent config ----------------
INPUT_RES = 16   # input_resolution
PATCH = 8        # patch_size
WIDTH = 32       # d_model
LAYERS = 2
HEADS = 4
OUT_DIM = 16     # output_dim
BATCH = 2

N_PATCH = (INPUT_RES // PATCH) ** 2      # 4
SEQ = N_PATCH + 1                        # 5 (cls token + patches)
HEAD_DIM = WIDTH // HEADS                # 8
CPP = 3 * PATCH * PATCH                  # 192 (in_channels * kh * kw)


# ---------------- in-kernel helpers ----------------
def _layernorm(x, g, b, eps=1e-5):
    mu = jnp.mean(x, axis=-1, keepdims=True)
    xc = x - mu
    var = jnp.mean(xc * xc, axis=-1, keepdims=True)
    return xc * jax.lax.rsqrt(var + eps) * g + b


def _softmax_last(s):
    s = s - jnp.max(s, axis=-1, keepdims=True)
    p = jnp.exp(s)
    denom = jnp.sum(p, axis=-1, keepdims=True)
    return p * pl.reciprocal(denom, approx=True)   # EUP slot, VALU stays free


# ---------------- the single fused ViT kernel (entire batch in one shot) ----------------
def _vit_kernel(patches_ref, convw_ref, pos_ref, glb_ref, bias_ref,
                wqkv_ref, bqkv_ref, wo_ref, lnv_ref,
                wfc_ref, bfc_ref, wpr_ref, proj_ref,
                o_ref, *, batch):
    # --- patch embedding for the whole batch: one (B*SEQ, CPP)@(CPP, D) dot.
    # cls rows of `patches` are zero, so adding pos (with the class embedding
    # folded into its cls rows) produces cls_token + pos[0] exactly. ---
    x = jnp.dot(patches_ref[...], convw_ref[...],
                preferred_element_type=jnp.float32) + pos_ref[...]     # (B*SEQ, D)
    x = _layernorm(x, glb_ref[0:1], glb_ref[1:2])                      # ln_pre

    bias = bias_ref[...]                                               # (B*SEQ, B*SEQ) additive mask

    for l in range(LAYERS):                                            # statically unrolled
        # ---------- attention branch ----------
        h = _layernorm(x, lnv_ref[l, 0:1], lnv_ref[l, 1:2])            # ln_1
        # fused QKV: single (B*SEQ, D)@(D, 3D) MXU dot; 1/sqrt(hd) already in Q cols
        qkv = jnp.dot(h, wqkv_ref[l],
                      preferred_element_type=jnp.float32) + bqkv_ref[l]  # (B*SEQ, 3D)
        ctx_heads = []
        for hh in range(HEADS):                                        # lane-contiguous head slices
            q = qkv[:, hh * HEAD_DIM:(hh + 1) * HEAD_DIM]
            k = qkv[:, WIDTH + hh * HEAD_DIM: WIDTH + (hh + 1) * HEAD_DIM]
            v = qkv[:, 2 * WIDTH + hh * HEAD_DIM: 2 * WIDTH + (hh + 1) * HEAD_DIM]
            s = jnp.einsum('ne,me->nm', q, k,
                           preferred_element_type=jnp.float32) + bias  # cross-batch masked
            p = _softmax_last(s)
            ctx_heads.append(jnp.dot(p, v, preferred_element_type=jnp.float32))
        ctx = jnp.concatenate(ctx_heads, axis=-1)                      # (B*SEQ, D), head-minor
        x = x + jnp.dot(ctx, wo_ref[l],
                        preferred_element_type=jnp.float32) + lnv_ref[l, 2:3]   # out-proj + bias

        # ---------- MLP branch (c_fc -> QuickGELU -> c_proj) ----------
        h2 = _layernorm(x, lnv_ref[l, 3:4], lnv_ref[l, 4:5])           # ln_2
        u = jnp.dot(h2, wfc_ref[l], preferred_element_type=jnp.float32) + bfc_ref[l]
        u = u * jax.nn.sigmoid(1.702 * u)                              # QuickGELU
        x = x + jnp.dot(u, wpr_ref[l],
                        preferred_element_type=jnp.float32) + lnv_ref[l, 5:6]

    # --- ln_post on the cls rows (row b*SEQ of each image), then projection ---
    cls = jnp.concatenate([x[b * SEQ:b * SEQ + 1, :] for b in range(batch)], axis=0)
    cls = _layernorm(cls, glb_ref[2:3], glb_ref[3:4])                  # (B, D)
    o_ref[...] = jnp.dot(cls, proj_ref[...], preferred_element_type=jnp.float32)


# ---------------- glue: patch extraction + weight packing + wrapper ----------------
def extract_patches_with_cls(x):
    # x: (B, 3, H, W) NCHW -> (B*SEQ, 3*p*p); row b*SEQ (cls slot) stays zero.
    # Patch flattening order (c, kh, kw) matches the Conv2d weight flattening.
    B, C, H, W = x.shape
    p = PATCH
    xp = x.reshape(B, C, H // p, p, W // p, p)
    xp = xp.transpose(0, 2, 4, 1, 3, 5)
    xp = xp.reshape(B, (H // p) * (W // p), C * p * p)
    buf = jnp.zeros((B, SEQ, C * p * p), jnp.float32)                  # pre-shaped, no concat copy
    buf = buf.at[:, 1:, :].set(xp)
    return buf.reshape(B * SEQ, C * p * p)


def _pack_params(params, batch):
    scale = HEAD_DIM ** -0.5
    conv_w2d = params['conv_w'].reshape(WIDTH, CPP).T                  # (CPP, D)
    pos_eff = params['pos'].at[0].add(params['cls'])                   # cls folded into row 0
    pos_tiled = jnp.tile(pos_eff, (batch, 1))                          # (B*SEQ, D)
    glb = jnp.concatenate([params['ln_pre_g'], params['ln_pre_b'],
                           params['ln_post_g'], params['ln_post_b']], axis=0)   # (4, D)

    # additive attention bias: 0 within an image, -1e30 across images (batch folding)
    row_b = np.arange(batch * SEQ) // SEQ
    same = row_b[:, None] == row_b[None, :]
    attn_bias = jnp.asarray(np.where(same, 0.0, -1e30), jnp.float32)   # (B*SEQ, B*SEQ)

    wqkv, bqkv, wo, lnv, wfc, bfc, wpr = [], [], [], [], [], [], []
    for blk in params['blocks']:
        # fold 1/sqrt(head_dim) into the Q columns / bias (wrapper-side, one time)
        w = blk['wqkv'].at[:, :WIDTH].multiply(scale)                  # (D, 3D)
        b = blk['bqkv'].at[:, :WIDTH].multiply(scale)                  # (1, 3D)
        wqkv.append(w)
        bqkv.append(b)
        wo.append(blk['wo'])                                           # (D, D)
        lnv.append(jnp.concatenate([blk['ln1_g'], blk['ln1_b'], blk['bo'],
                                    blk['ln2_g'], blk['ln2_b'], blk['bpr']],
                                   axis=0))                            # (6, D)
        wfc.append(blk['wfc']); bfc.append(blk['bfc']); wpr.append(blk['wpr'])

    return dict(
        conv_w2d=conv_w2d, pos=pos_tiled, glb=glb, attn_bias=attn_bias,
        wqkv=jnp.stack(wqkv),          # (LAYERS, D, 3D)   (Q cols pre-scaled)
        bqkv=jnp.stack(bqkv),          # (LAYERS, 1, 3D)
        wo=jnp.stack(wo),              # (LAYERS, D, D)
        lnv=jnp.stack(lnv),            # (LAYERS, 6, D)
        wfc=jnp.stack(wfc),            # (LAYERS, D, 4D)
        bfc=jnp.stack(bfc),            # (LAYERS, 1, 4D)
        wpr=jnp.stack(wpr),            # (LAYERS, 4D, D)
        proj=params['proj'])           # (D, OUT_DIM)


def vit_forward(x_img, params):
    B = x_img.shape[0]
    pk = _pack_params(params, B)
    patches = extract_patches_with_cls(x_img)                          # (B*SEQ, CPP)

    inputs = [patches, pk['conv_w2d'], pk['pos'], pk['glb'], pk['attn_bias'],
              pk['wqkv'], pk['bqkv'], pk['wo'], pk['lnv'],
              pk['wfc'], pk['bfc'], pk['wpr'], pk['proj']]

    # Whole forward in a single gridless pallas_call: every array is one
    # VMEM-resident block, activations never leave vregs/VMEM, and the fixed
    # per-grid-step cost is paid exactly once.
    out = pl.pallas_call(
        functools.partial(_vit_kernel, batch=B),
        out_shape=jax.ShapeDtypeStruct((B, OUT_DIM), jnp.float32),
        compiler_params=pltpu.CompilerParams(vmem_limit_bytes=32 * 1024 * 1024),
    )(*inputs)
    return out


# ---------------- deterministic parameter init ----------------
def init_params(key):
    scale = WIDTH ** -0.5
    keys = iter(jax.random.split(key, 3 + 4 * LAYERS + 1))
    params = {
        'conv_w': jax.random.normal(next(keys), (WIDTH, 3, PATCH, PATCH), jnp.float32)
                  * (1.0 / math.sqrt(CPP)),
        'cls': scale * jax.random.normal(next(keys), (WIDTH,), jnp.float32),
        'pos': scale * jax.random.normal(next(keys), (SEQ, WIDTH), jnp.float32),
        'ln_pre_g': jnp.ones((1, WIDTH), jnp.float32),
        'ln_pre_b': jnp.zeros((1, WIDTH), jnp.float32),
        'ln_post_g': jnp.ones((1, WIDTH), jnp.float32),
        'ln_post_b': jnp.zeros((1, WIDTH), jnp.float32),
    }
    blocks = []
    d = WIDTH
    for _ in range(LAYERS):
        blocks.append(dict(
            ln1_g=jnp.ones((1, d), jnp.float32), ln1_b=jnp.zeros((1, d), jnp.float32),
            wqkv=jax.random.normal(next(keys), (d, 3 * d), jnp.float32) * (d ** -0.5),
            bqkv=jnp.zeros((1, 3 * d), jnp.float32),
            wo=jax.random.normal(next(keys), (d, d), jnp.float32) * (d ** -0.5),
            bo=jnp.zeros((1, d), jnp.float32),
            ln2_g=jnp.ones((1, d), jnp.float32), ln2_b=jnp.zeros((1, d), jnp.float32),
            wfc=jax.random.normal(next(keys), (d, 4 * d), jnp.float32) * (d ** -0.5),
            bfc=jnp.zeros((1, 4 * d), jnp.float32),
            wpr=jax.random.normal(next(keys), (4 * d, d), jnp.float32) * ((4 * d) ** -0.5),
            bpr=jnp.zeros((1, d), jnp.float32),
        ))
    params['blocks'] = blocks
    params['proj'] = scale * jax.random.normal(next(keys), (WIDTH, OUT_DIM), jnp.float32)
    return params


# ---------------- pure-JAX reference for verification ----------------
def _ref_ln(x, g, b, eps=1e-5):
    mu = jnp.mean(x, axis=-1, keepdims=True)
    var = jnp.mean((x - mu) ** 2, axis=-1, keepdims=True)
    return (x - mu) / jnp.sqrt(var + eps) * g + b


def _ref_extract_patches(x):
    B, C, H, W = x.shape
    p = PATCH
    xp = x.reshape(B, C, H // p, p, W // p, p).transpose(0, 2, 4, 1, 3, 5)
    return xp.reshape(B, (H // p) * (W // p), C * p * p)


def ref_forward(x_img, params):
    B = x_img.shape[0]
    patches = _ref_extract_patches(x_img)
    conv_w2d = params['conv_w'].reshape(WIDTH, CPP).T
    tok = patches @ conv_w2d
    cls = jnp.broadcast_to(params['cls'][None, None, :], (B, 1, WIDTH))
    x = jnp.concatenate([cls, tok], axis=1) + params['pos']
    x = _ref_ln(x, params['ln_pre_g'], params['ln_pre_b'])
    for blk in params['blocks']:
        h = _ref_ln(x, blk['ln1_g'], blk['ln1_b'])
        qkv = h @ blk['wqkv'] + blk['bqkv']
        q, k, v = jnp.split(qkv, 3, axis=-1)
        q = q.reshape(B, SEQ, HEADS, HEAD_DIM) / math.sqrt(HEAD_DIM)
        k = k.reshape(B, SEQ, HEADS, HEAD_DIM)
        v = v.reshape(B, SEQ, HEADS, HEAD_DIM)
        s = jnp.einsum('blhe,bmhe->bhlm', q, k)
        p = jax.nn.softmax(s, axis=-1)
        o = jnp.einsum('bhlm,bmhe->blhe', p, v).reshape(B, SEQ, WIDTH)
        x = x + o @ blk['wo'] + blk['bo']
        h2 = _ref_ln(x, blk['ln2_g'], blk['ln2_b'])
        u = h2 @ blk['wfc'] + blk['bfc']
        u = u * jax.nn.sigmoid(1.702 * u)
        x = x + u @ blk['wpr'] + blk['bpr']
    cls_out = _ref_ln(x[:, 0, :], params['ln_post_g'], params['ln_post_b'])
    return cls_out @ params['proj']


if __name__ == "__main__":
    key = jax.random.PRNGKey(0)
    k_img, k_par = jax.random.split(key)
    x_img = jax.random.normal(k_img, (BATCH, 3, INPUT_RES, INPUT_RES), jnp.float32)
    params = init_params(k_par)

    out = vit_forward(x_img, params)
    out = jax.block_until_ready(out)
    assert out.shape == (BATCH, OUT_DIM)

    ref = ref_forward(x_img, params)
    np.testing.assert_allclose(np.asarray(out), np.asarray(ref), atol=5e-3, rtol=5e-3)
    print("KERNEL_OK")
</pallas_src>

<mosaic_0001>
module attributes {stable_mosaic.version = 11 : i64} {
  func.func @_vit_kernel(%arg0: memref<10x192xf32, #tpu.memory_space<vmem>>, %arg1: memref<192x32xf32, #tpu.memory_space<vmem>>, %arg2: memref<10x32xf32, #tpu.memory_space<vmem>>, %arg3: memref<4x32xf32, #tpu.memory_space<vmem>>, %arg4: memref<10x10xf32, #tpu.memory_space<vmem>>, %arg5: memref<2x32x96xf32, #tpu.memory_space<vmem>>, %arg6: memref<2x1x96xf32, #tpu.memory_space<vmem>>, %arg7: memref<2x32x32xf32, #tpu.memory_space<vmem>>, %arg8: memref<2x6x32xf32, #tpu.memory_space<vmem>>, %arg9: memref<2x32x128xf32, #tpu.memory_space<vmem>>, %arg10: memref<2x1x128xf32, #tpu.memory_space<vmem>>, %arg11: memref<2x128x32xf32, #tpu.memory_space<vmem>>, %arg12: memref<32x16xf32, #tpu.memory_space<vmem>>, %arg13: memref<2x16xf32, #tpu.memory_space<vmem>>) attributes {dimension_semantics = [], scalar_prefetch = 0 : i64, scratch_operands = 0 : i64, tpu.core_type = #tpu.core_type<tc>} {
    %c0 = arith.constant 0 : index
    %c0_0 = arith.constant 0 : index
    %0 = vector.load %arg0[%c0, %c0_0] : memref<10x192xf32, #tpu.memory_space<vmem>>, vector<10x192xf32>
    %c0_1 = arith.constant 0 : index
    %c0_2 = arith.constant 0 : index
    %1 = vector.load %arg1[%c0_1, %c0_2] : memref<192x32xf32, #tpu.memory_space<vmem>>, vector<192x32xf32>
    %cst = arith.constant dense<0.000000e+00> : vector<10x32xf32>
    %2 = tpu.matmul %0, %1, %cst {dimension_numbers = #tpu.dot_dimension_numbers<[1], [0], [0], [1], [0, 0, 1, 1], [], []>} : vector<10x192xf32>, vector<192x32xf32>, vector<10x32xf32> -> vector<10x32xf32>
    %c0_3 = arith.constant 0 : index
    %c0_4 = arith.constant 0 : index
    %3 = vector.load %arg2[%c0_3, %c0_4] : memref<10x32xf32, #tpu.memory_space<vmem>>, vector<10x32xf32>
    %4 = arith.addf %2, %3 : vector<10x32xf32>
    %c0_5 = arith.constant 0 : index
    %c0_6 = arith.constant 0 : index
    %5 = vector.load %arg3[%c0_5, %c0_6] : memref<4x32xf32, #tpu.memory_space<vmem>>, vector<1x32xf32>
    %c1 = arith.constant 1 : index
    %c0_7 = arith.constant 0 : index
    %6 = vector.load %arg3[%c1, %c0_7] : memref<4x32xf32, #tpu.memory_space<vmem>>, vector<1x32xf32>
    %cst_8 = arith.constant dense<0.000000e+00> : vector<10xf32>
    %7 = vector.multi_reduction <add>, %4, %cst_8 [1] : vector<10x32xf32> to vector<10xf32>
    %8 = vector.shape_cast %7 : vector<10xf32> to vector<10x1xf32>
    %cst_9 = arith.constant 3.200000e+01 : f32
    %9 = vector.broadcast %cst_9 : f32 to vector<10x1xf32>
    %10 = arith.divf %8, %9 : vector<10x1xf32>
    %11 = vector.broadcast %10 : vector<10x1xf32> to vector<10x32xf32>
    %12 = arith.subf %4, %11 : vector<10x32xf32>
    %13 = arith.mulf %12, %12 : vector<10x32xf32>
    %cst_10 = arith.constant dense<0.000000e+00> : vector<10xf32>
    %14 = vector.multi_reduction <add>, %13, %cst_10 [1] : vector<10x32xf32> to vector<10xf32>
    %15 = vector.shape_cast %14 : vector<10xf32> to vector<10x1xf32>
    %cst_11 = arith.constant 3.200000e+01 : f32
    %16 = vector.broadcast %cst_11 : f32 to vector<10x1xf32>
    %17 = arith.divf %15, %16 : vector<10x1xf32>
    %cst_12 = arith.constant 9.99999974E-6 : f32
    %18 = vector.broadcast %cst_12 : f32 to vector<10x1xf32>
    %19 = arith.addf %17, %18 : vector<10x1xf32>
    %20 = math.rsqrt %19 : vector<10x1xf32>
    %21 = vector.broadcast %20 : vector<10x1xf32> to vector<10x32xf32>
    %22 = arith.mulf %12, %21 : vector<10x32xf32>
    %23 = vector.broadcast %5 : vector<1x32xf32> to vector<10x32xf32>
    %24 = arith.mulf %22, %23 : vector<10x32xf32>
    %25 = vector.broadcast %6 : vector<1x32xf32> to vector<10x32xf32>
    %26 = arith.addf %24, %25 : vector<10x32xf32>
    %c0_13 = arith.constant 0 : index
    %c0_14 = arith.constant 0 : index
    %27 = vector.load %arg4[%c0_13, %c0_14] : memref<10x10xf32, #tpu.memory_space<vmem>>, vector<10x10xf32>
    %c0_15 = arith.constant 0 : index
    %c0_16 = arith.constant 0 : index
    %c0_17 = arith.constant 0 : index
    %28 = vector.load %arg8[%c0_15, %c0_16, %c0_17] : memref<2x6x32xf32, #tpu.memory_space<vmem>>, vector<1x1x32xf32>
    %29 = vector.shape_cast %28 : vector<1x1x32xf32> to vector<1x32xf32>
    %c0_18 = arith.constant 0 : index
    %c1_19 = arith.constant 1 : index
    %c0_20 = arith.constant 0 : index
    %30 = vector.load %arg8[%c0_18, %c1_19, %c0_20] : memref<2x6x32xf32, #tpu.memory_space<vmem>>, vector<1x1x32xf32>
    %31 = vector.shape_cast %30 : vector<1x1x32xf32> to vector<1x32xf32>
    %cst_21 = arith.constant dense<0.000000e+00> : vector<10xf32>
    %32 = vector.multi_reduction <add>, %26, %cst_21 [1] : vector<10x32xf32> to vector<10xf32>
    %33 = vector.shape_cast %32 : vector<10xf32> to vector<10x1xf32>
    %cst_22 = arith.constant 3.200000e+01 : f32
    %34 = vector.broadcast %cst_22 : f32 to vector<10x1xf32>
    %35 = arith.divf %33, %34 : vector<10x1xf32>
    %36 = vector.broadcast %35 : vector<10x1xf32> to vector<10x32xf32>
    %37 = arith.subf %26, %36 : vector<10x32xf32>
    %38 = arith.mulf %37, %37 : vector<10x32xf32>
    %cst_23 = arith.constant dense<0.000000e+00> : vector<10xf32>
    %39 = vector.multi_reduction <add>, %38, %cst_23 [1] : vector<10x32xf32> to vector<10xf32>
    %40 = vector.shape_cast %39 : vector<10xf32> to vector<10x1xf32>
    %cst_24 = arith.constant 3.200000e+01 : f32
    %41 = vector.broadcast %cst_24 : f32 to vector<10x1xf32>
    %42 = arith.divf %40, %41 : vector<10x1xf32>
    %cst_25 = arith.constant 9.99999974E-6 : f32
    %43 = vector.broadcast %cst_25 : f32 to vector<10x1xf32>
    %44 = arith.addf %42, %43 : vector<10x1xf32>
    %45 = math.rsqrt %44 : vector<10x1xf32>
    %46 = vector.broadcast %45 : vector<10x1xf32> to vector<10x32xf32>
    %47 = arith.mulf %37, %46 : vector<10x32xf32>
    %48 = vector.broadcast %29 : vector<1x32xf32> to vector<10x32xf32>
    %49 = arith.mulf %47, %48 : vector<10x32xf32>
    %50 = vector.broadcast %31 : vector<1x32xf32> to vector<10x32xf32>
    %51 = arith.addf %49, %50 : vector<10x32xf32>
    %c0_26 = arith.constant 0 : index
    %c0_27 = arith.constant 0 : index
    %c0_28 = arith.constant 0 : index
    %52 = vector.load %arg5[%c0_26, %c0_27, %c0_28] : memref<2x32x96xf32, #tpu.memory_space<vmem>>, vector<1x32x96xf32>
    %53 = vector.shape_cast %52 : vector<1x32x96xf32> to vector<32x96xf32>
    %cst_29 = arith.constant dense<0.000000e+00> : vector<10x96xf32>
    %54 = tpu.matmul %51, %53, %cst_29 {dimension_numbers = #tpu.dot_dimension_numbers<[1], [0], [0], [1], [0, 0, 1, 1], [], []>} : vector<10x32xf32>, vector<32x96xf32>, vector<10x96xf32> -> vector<10x96xf32>
    %c0_30 = arith.constant 0 : index
    %c0_31 = arith.constant 0 : index
    %c0_32 = arith.constant 0 : index
    %55 = vector.load %arg6[%c0_30, %c0_31, %c0_32] : memref<2x1x96xf32, #tpu.memory_space<vmem>>, vector<1x1x96xf32>
    %56 = vector.shape_cast %55 : vector<1x1x96xf32> to vector<1x96xf32>
    %57 = vector.broadcast %56 : vector<1x96xf32> to vector<10x96xf32>
    %58 = arith.addf %54, %57 : vector<10x96xf32>
    %59 = vector.extract_strided_slice %58 {offsets = [0, 0], sizes = [10, 8], strides = [1, 1]} : vector<10x96xf32> to vector<10x8xf32>
    %60 = vector.extract_strided_slice %58 {offsets = [0, 32], sizes = [10, 8], strides = [1, 1]} : vector<10x96xf32> to vector<10x8xf32>
    %61 = vector.extract_strided_slice %58 {offsets = [0, 64], sizes = [10, 8], strides = [1, 1]} : vector<10x96xf32> to vector<10x8xf32>
    "tpu.trace_start"() <{level = 10 : i32, message = "ne,me->nm"}> : () -> ()
    %cst_33 = arith.constant dense<0.000000e+00> : vector<10x10xf32>
    %62 = tpu.matmul %59, %60, %cst_33 {dimension_numbers = #tpu.dot_dimension_numbers<[1], [1], [0], [0], [0, 0, 1, 0], [], []>} : vector<10x8xf32>, vector<10x8xf32>, vector<10x10xf32> -> vector<10x10xf32>
    "tpu.trace_stop"() : () -> ()
    %63 = arith.addf %62, %27 : vector<10x10xf32>
    %cst_34 = arith.constant dense<0xFF800000> : vector<10xf32>
    %64 = vector.multi_reduction <maximumf>, %63, %cst_34 [1] : vector<10x10xf32> to vector<10xf32>
    %65 = vector.shape_cast %64 : vector<10xf32> to vector<10x1xf32>
    %66 = vector.broadcast %65 : vector<10x1xf32> to vector<10x10xf32>
    %67 = arith.subf %63, %66 : vector<10x10xf32>
    %68 = math.exp %67 : vector<10x10xf32>
    %cst_35 = arith.constant dense<0.000000e+00> : vector<10xf32>
    %69 = vector.multi_reduction <add>, %68, %cst_35 [1] : vector<10x10xf32> to vector<10xf32>
    %70 = vector.shape_cast %69 : vector<10xf32> to vector<10x1xf32>
    %71 = tpu.reciprocal %70 {approx = true} : vector<10x1xf32> -> vector<10x1xf32>
    %72 = vector.broadcast %71 : vector<10x1xf32> to vector<10x10xf32>
    %73 = arith.mulf %68, %72 : vector<10x10xf32>
    %cst_36 = arith.constant dense<0.000000e+00> : vector<10x8xf32>
    %74 = tpu.matmul %73, %61, %cst_36 {dimension_numbers = #tpu.dot_dimension_numbers<[1], [0], [0], [1], [0, 0, 1, 1], [], []>} : vector<10x10xf32>, vector<10x8xf32>, vector<10x8xf32> -> vector<10x8xf32>
    %75 = vector.extract_strided_slice %58 {offsets = [0, 8], sizes = [10, 8], strides = [1, 1]} : vector<10x96xf32> to vector<10x8xf32>
    %76 = vector.extract_strided_slice %58 {offsets = [0, 40], sizes = [10, 8], strides = [1, 1]} : vector<10x96xf32> to vector<10x8xf32>
    %77 = vector.extract_strided_slice %58 {offsets = [0, 72], sizes = [10, 8], strides = [1, 1]} : vector<10x96xf32> to vector<10x8xf32>
    "tpu.trace_start"() <{level = 10 : i32, message = "ne,me->nm"}> : () -> ()
    %cst_37 = arith.constant dense<0.000000e+00> : vector<10x10xf32>
    %78 = tpu.matmul %75, %76, %cst_37 {dimension_numbers = #tpu.dot_dimension_numbers<[1], [1], [0], [0], [0, 0, 1, 0], [], []>} : vector<10x8xf32>, vector<10x8xf32>, vector<10x10xf32> -> vector<10x10xf32>
    "tpu.trace_stop"() : () -> ()
    %79 = arith.addf %78, %27 : vector<10x10xf32>
    %cst_38 = arith.constant dense<0xFF800000> : vector<10xf32>
    %80 = vector.multi_reduction <maximumf>, %79, %cst_38 [1] : vector<10x10xf32> to vector<10xf32>
    %81 = vector.shape_cast %80 : vector<10xf32> to vector<10x1xf32>
    %82 = vector.broadcast %81 : vector<10x1xf32> to vector<10x10xf32>
    %83 = arith.subf %79, %82 : vector<10x10xf32>
    %84 = math.exp %83 : vector<10x10xf32>
    %cst_39 = arith.constant dense<0.000000e+00> : vector<10xf32>
    %85 = vector.multi_reduction <add>, %84, %cst_39 [1] : vector<10x10xf32> to vector<10xf32>
    %86 = vector.shape_cast %85 : vector<10xf32> to vector<10x1xf32>
    %87 = tpu.reciprocal %86 {approx = true} : vector<10x1xf32> -> vector<10x1xf32>
    %88 = vector.broadcast %87 : vector<10x1xf32> to vector<10x10xf32>
    %89 = arith.mulf %84, %88 : vector<10x10xf32>
    %cst_40 = arith.constant dense<0.000000e+00> : vector<10x8xf32>
    %90 = tpu.matmul %89, %77, %cst_40 {dimension_numbers = #tpu.dot_dimension_numbers<[1], [0], [0], [1], [0, 0, 1, 1], [], []>} : vector<10x10xf32>, vector<10x8xf32>, vector<10x8xf32> -> vector<10x8xf32>
    %91 = vector.extract_strided_slice %58 {offsets = [0, 16], sizes = [10, 8], strides = [1, 1]} : vector<10x96xf32> to vector<10x8xf32>
    %92 = vector.extract_strided_slice %58 {offsets = [0, 48], sizes = [10, 8], strides = [1, 1]} : vector<10x96xf32> to vector<10x8xf32>
    %93 = vector.extract_strided_slice %58 {offsets = [0, 80], sizes = [10, 8], strides = [1, 1]} : vector<10x96xf32> to vector<10x8xf32>
    "tpu.trace_start"() <{level = 10 : i32, message = "ne,me->nm"}> : () -> ()
    %cst_41 = arith.constant dense<0.000000e+00> : vector<10x10xf32>
    %94 = tpu.matmul %91, %92, %cst_41 {dimension_numbers = #tpu.dot_dimension_numbers<[1], [1], [0], [0], [0, 0, 1, 0], [], []>} : vector<10x8xf32>, vector<10x8xf32>, vector<10x10xf32> -> vector<10x10xf32>
    "tpu.trace_stop"() : () -> ()
    %95 = arith.addf %94, %27 : vector<10x10xf32>
    %cst_42 = arith.constant dense<0xFF800000> : vector<10xf32>
    %96 = vector.multi_reduction <maximumf>, %95, %cst_42 [1] : vector<10x10xf32> to vector<10xf32>
    %97 = vector.shape_cast %96 : vector<10xf32> to vector<10x1xf32>
    %98 = vector.broadcast %97 : vector<10x1xf32> to vector<10x10xf32>
    %99 = arith.subf %95, %98 : vector<10x10xf32>
    %100 = math.exp %99 : vector<10x10xf32>
    %cst_43 = arith.constant dense<0.000000e+00> : vector<10xf32>
    %101 = vector.multi_reduction <add>, %100, %cst_43 [1] : vector<10x10xf32> to vector<10xf32>
    %102 = vector.shape_cast %101 : vector<10xf32> to vector<10x1xf32>
    %103 = tpu.reciprocal %102 {approx = true} : vector<10x1xf32> -> vector<10x1xf32>
    %104 = vector.broadcast %103 : vector<10x1xf32> to vector<10x10xf32>
    %105 = arith.mulf %100, %104 : vector<10x10xf32>
    %cst_44 = arith.constant dense<0.000000e+00> : vector<10x8xf32>
    %106 = tpu.matmul %105, %93, %cst_44 {dimension_numbers = #tpu.dot_dimension_numbers<[1], [0], [0], [1], [0, 0, 1, 1], [], []>} : vector<10x10xf32>, vector<10x8xf32>, vector<10x8xf32> -> vector<10x8xf32>
    %107 = vector.extract_strided_slice %58 {offsets = [0, 24], sizes = [10, 8], strides = [1, 1]} : vector<10x96xf32> to vector<10x8xf32>
    %108 = vector.extract_strided_slice %58 {offsets = [0, 56], sizes = [10, 8], strides = [1, 1]} : vector<10x96xf32> to vector<10x8xf32>
    %109 = vector.extract_strided_slice %58 {offsets = [0, 88], sizes = [10, 8], strides = [1, 1]} : vector<10x96xf32> to vector<10x8xf32>
    "tpu.trace_start"() <{level = 10 : i32, message = "ne,me->nm"}> : () -> ()
    %cst_45 = arith.constant dense<0.000000e+00> : vector<10x10xf32>
    %110 = tpu.matmul %107, %108, %cst_45 {dimension_numbers = #tpu.dot_dimension_numbers<[1], [1], [0], [0], [0, 0, 1, 0], [], []>} : vector<10x8xf32>, vector<10x8xf32>, vector<10x10xf32> -> vector<10x10xf32>
    "tpu.trace_stop"() : () -> ()
    %111 = arith.addf %110, %27 : vector<10x10xf32>
    %cst_46 = arith.constant dense<0xFF800000> : vector<10xf32>
    %112 = vector.multi_reduction <maximumf>, %111, %cst_46 [1] : vector<10x10xf32> to vector<10xf32>
    %113 = vector.shape_cast %112 : vector<10xf32> to vector<10x1xf32>
    %114 = vector.broadcast %113 : vector<10x1xf32> to vector<10x10xf32>
    %115 = arith.subf %111, %114 : vector<10x10xf32>
    %116 = math.exp %115 : vector<10x10xf32>
    %cst_47 = arith.constant dense<0.000000e+00> : vector<10xf32>
    %117 = vector.multi_reduction <add>, %116, %cst_47 [1] : vector<10x10xf32> to vector<10xf32>
    %118 = vector.shape_cast %117 : vector<10xf32> to vector<10x1xf32>
    %119 = tpu.reciprocal %118 {approx = true} : vector<10x1xf32> -> vector<10x1xf32>
    %120 = vector.broadcast %119 : vector<10x1xf32> to vector<10x10xf32>
    %121 = arith.mulf %116, %120 : vector<10x10xf32>
    %cst_48 = arith.constant dense<0.000000e+00> : vector<10x8xf32>
    %122 = tpu.matmul %121, %109, %cst_48 {dimension_numbers = #tpu.dot_dimension_numbers<[1], [0], [0], [1], [0, 0, 1, 1], [], []>} : vector<10x10xf32>, vector<10x8xf32>, vector<10x8xf32> -> vector<10x8xf32>
    %123 = tpu.concatenate %74, %90, %106, %122 in 1 : vector<10x8xf32>, vector<10x8xf32>, vector<10x8xf32>, vector<10x8xf32> -> vector<10x32xf32>
    %c0_49 = arith.constant 0 : index
    %c0_50 = arith.constant 0 : index
    %c0_51 = arith.constant 0 : index
    %124 = vector.load %arg7[%c0_49, %c0_50, %c0_51] : memref<2x32x32xf32, #tpu.memory_space<vmem>>, vector<1x32x32xf32>
    %125 = vector.shape_cast %124 : vector<1x32x32xf32> to vector<32x32xf32>
    %cst_52 = arith.constant dense<0.000000e+00> : vector<10x32xf32>
    %126 = tpu.matmul %123, %125, %cst_52 {dimension_numbers = #tpu.dot_dimension_numbers<[1], [0], [0], [1], [0, 0, 1, 1], [], []>} : vector<10x32xf32>, vector<32x32xf32>, vector<10x32xf32> -> vector<10x32xf32>
    %127 = arith.addf %26, %126 : vector<10x32xf32>
    %c0_53 = arith.constant 0 : index
    %c2 = arith.constant 2 : index
    %c0_54 = arith.constant 0 : index
    %128 = vector.load %arg8[%c0_53, %c2, %c0_54] : memref<2x6x32xf32, #tpu.memory_space<vmem>>, vector<1x1x32xf32>
    %129 = vector.shape_cast %128 : vector<1x1x32xf32> to vector<1x32xf32>
    %130 = vector.broadcast %129 : vector<1x32xf32> to vector<10x32xf32>
    %131 = arith.addf %127, %130 : vector<10x32xf32>
    %c0_55 = arith.constant 0 : index
    %c3 = arith.constant 3 : index
    %c0_56 = arith.constant 0 : index
    %132 = vector.load %arg8[%c0_55, %c3, %c0_56] : memref<2x6x32xf32, #tpu.memory_space<vmem>>, vector<1x1x32xf32>
    %133 = vector.shape_cast %132 : vector<1x1x32xf32> to vector<1x32xf32>
    %c0_57 = arith.constant 0 : index
    %c4 = arith.constant 4 : index
    %c0_58 = arith.constant 0 : index
    %134 = vector.load %arg8[%c0_57, %c4, %c0_58] : memref<2x6x32xf32, #tpu.memory_space<vmem>>, vector<1x1x32xf32>
    %135 = vector.shape_cast %134 : vector<1x1x32xf32> to vector<1x32xf32>
    %cst_59 = arith.constant dense<0.000000e+00> : vector<10xf32>
    %136 = vector.multi_reduction <add>, %131, %cst_59 [1] : vector<10x32xf32> to vector<10xf32>
    %137 = vector.shape_cast %136 : vector<10xf32> to vector<10x1xf32>
    %cst_60 = arith.constant 3.200000e+01 : f32
    %138 = vector.broadcast %cst_60 : f32 to vector<10x1xf32>
    %139 = arith.divf %137, %138 : vector<10x1xf32>
    %140 = vector.broadcast %139 : vector<10x1xf32> to vector<10x32xf32>
    %141 = arith.subf %131, %140 : vector<10x32xf32>
    %142 = arith.mulf %141, %141 : vector<10x32xf32>
    %cst_61 = arith.constant dense<0.000000e+00> : vector<10xf32>
    %143 = vector.multi_reduction <add>, %142, %cst_61 [1] : vector<10x32xf32> to vector<10xf32>
    %144 = vector.shape_cast %143 : vector<10xf32> to vector<10x1xf32>
    %cst_62 = arith.constant 3.200000e+01 : f32
    %145 = vector.broadcast %cst_62 : f32 to vector<10x1xf32>
    %146 = arith.divf %144, %145 : vector<10x1xf32>
    %cst_63 = arith.constant 9.99999974E-6 : f32
    %147 = vector.broadcast %cst_63 : f32 to vector<10x1xf32>
    %148 = arith.addf %146, %147 : vector<10x1xf32>
    %149 = math.rsqrt %148 : vector<10x1xf32>
    %150 = vector.broadcast %149 : vector<10x1xf32> to vector<10x32xf32>
    %151 = arith.mulf %141, %150 : vector<10x32xf32>
    %152 = vector.broadcast %133 : vector<1x32xf32> to vector<10x32xf32>
    %153 = arith.mulf %151, %152 : vector<10x32xf32>
    %154 = vector.broadcast %135 : vector<1x32xf32> to vector<10x32xf32>
    %155 = arith.addf %153, %154 : vector<10x32xf32>
    %c0_64 = arith.constant 0 : index
    %c0_65 = arith.constant 0 : index
    %c0_66 = arith.constant 0 : index
    %156 = vector.load %arg9[%c0_64, %c0_65, %c0_66] : memref<2x32x128xf32, #tpu.memory_space<vmem>>, vector<1x32x128xf32>
    %157 = vector.shape_cast %156 : vector<1x32x128xf32> to vector<32x128xf32>
    %cst_67 = arith.constant dense<0.000000e+00> : vector<10x128xf32>
    %158 = tpu.matmul %155, %157, %cst_67 {dimension_numbers = #tpu.dot_dimension_numbers<[1], [0], [0], [1], [0, 0, 1, 1], [], []>} : vector<10x32xf32>, vector<32x128xf32>, vector<10x128xf32> -> vector<10x128xf32>
    %c0_68 = arith.constant 0 : index
    %c0_69 = arith.constant 0 : index
    %c0_70 = arith.constant 0 : index
    %159 = vector.load %arg10[%c0_68, %c0_69, %c0_70] : memref<2x1x128xf32, #tpu.memory_space<vmem>>, vector<1x1x128xf32>
    %160 = vector.shape_cast %159 : vector<1x1x128xf32> to vector<1x128xf32>
    %161 = vector.broadcast %160 : vector<1x128xf32> to vector<10x128xf32>
    %162 = arith.addf %158, %161 : vector<10x128xf32>
    %cst_71 = arith.constant 1.702000e+00 : f32
    %163 = vector.broadcast %cst_71 : f32 to vector<10x128xf32>
    %164 = arith.mulf %163, %162 : vector<10x128xf32>
    %165 = arith.negf %164 : vector<10x128xf32>
    %166 = math.exp %165 : vector<10x128xf32>
    %cst_72 = arith.constant 1.000000e+00 : f32
    %167 = vector.broadcast %cst_72 : f32 to vector<10x128xf32>
    %168 = arith.addf %167, %166 : vector<10x128xf32>
    %169 = arith.divf %167, %168 : vector<10x128xf32>
    %170 = arith.mulf %162, %169 : vector<10x128xf32>
    %c0_73 = arith.constant 0 : index
    %c0_74 = arith.constant 0 : index
    %c0_75 = arith.constant 0 : index
    %171 = vector.load %arg11[%c0_73, %c0_74, %c0_75] : memref<2x128x32xf32, #tpu.memory_space<vmem>>, vector<1x128x32xf32>
    %172 = vector.shape_cast %171 : vector<1x128x32xf32> to vector<128x32xf32>
    %cst_76 = arith.constant dense<0.000000e+00> : vector<10x32xf32>
    %173 = tpu.matmul %170, %172, %cst_76 {dimension_numbers = #tpu.dot_dimension_numbers<[1], [0], [0], [1], [0, 0, 1, 1], [], []>} : vector<10x128xf32>, vector<128x32xf32>, vector<10x32xf32> -> vector<10x32xf32>
    %174 = arith.addf %131, %173 : vector<10x32xf32>
    %c0_77 = arith.constant 0 : index
    %c5 = arith.constant 5 : index
    %c0_78 = arith.constant 0 : index
    %175 = vector.load %arg8[%c0_77, %c5, %c0_78] : memref<2x6x32xf32, #tpu.memory_space<vmem>>, vector<1x1x32xf32>
    %176 = vector.shape_cast %175 : vector<1x1x32xf32> to vector<1x32xf32>
    %177 = vector.broadcast %176 : vector<1x32xf32> to vector<10x32xf32>
    %178 = arith.addf %174, %177 : vector<10x32xf32>
    %c1_79 = arith.constant 1 : index
    %c0_80 = arith.constant 0 : index
    %c0_81 = arith.constant 0 : index
    %179 = vector.load %arg8[%c1_79, %c0_80, %c0_81] : memref<2x6x32xf32, #tpu.memory_space<vmem>>, vector<1x1x32xf32>
    %180 = vector.shape_cast %179 : vector<1x1x32xf32> to vector<1x32xf32>
    %c1_82 = arith.constant 1 : index
    %c1_83 = arith.constant 1 : index
    %c0_84 = arith.constant 0 : index
    %181 = vector.load %arg8[%c1_82, %c1_83, %c0_84] : memref<2x6x32xf32, #tpu.memory_space<vmem>>, vector<1x1x32xf32>
    %182 = vector.shape_cast %181 : vector<1x1x32xf32> to vector<1x32xf32>
    %cst_85 = arith.constant dense<0.000000e+00> : vector<10xf32>
    %183 = vector.multi_reduction <add>, %178, %cst_85 [1] : vector<10x32xf32> to vector<10xf32>
    %184 = vector.shape_cast %183 : vector<10xf32> to vector<10x1xf32>
    %cst_86 = arith.constant 3.200000e+01 : f32
    %185 = vector.broadcast %cst_86 : f32 to vector<10x1xf32>
    %186 = arith.divf %184, %185 : vector<10x1xf32>
    %187 = vector.broadcast %186 : vector<10x1xf32> to vector<10x32xf32>
    %188 = arith.subf %178, %187 : vector<10x32xf32>
    %189 = arith.mulf %188, %188 : vector<10x32xf32>
    %cst_87 = arith.constant dense<0.000000e+00> : vector<10xf32>
    %190 = vector.multi_reduction <add>, %189, %cst_87 [1] : vector<10x32xf32> to vector<10xf32>
    %191 = vector.shape_cast %190 : vector<10xf32> to vector<10x1xf32>
    %cst_88 = arith.constant 3.200000e+01 : f32
    %192 = vector.broadcast %cst_88 : f32 to vector<10x1xf32>
    %193 = arith.divf %191, %192 : vector<10x1xf32>
    %cst_89 = arith.constant 9.99999974E-6 : f32
    %194 = vector.broadcast %cst_89 : f32 to vector<10x1xf32>
    %195 = arith.addf %193, %194 : vector<10x1xf32>
    %196 = math.rsqrt %195 : vector<10x1xf32>
    %197 = vector.broadcast %196 : vector<10x1xf32> to vector<10x32xf32>
    %198 = arith.mulf %188, %197 : vector<10x32xf32>
    %199 = vector.broadcast %180 : vector<1x32xf32> to vector<10x32xf32>
    %200 = arith.mulf %198, %199 : vector<10x32xf32>
    %201 = vector.broadcast %182 : vector<1x32xf32> to vector<10x32xf32>
    %202 = arith.addf %200, %201 : vector<10x32xf32>
    %c1_90 = arith.constant 1 : index
    %c0_91 = arith.constant 0 : index
    %c0_92 = arith.constant 0 : index
    %203 = vector.load %arg5[%c1_90, %c0_91, %c0_92] : memref<2x32x96xf32, #tpu.memory_space<vmem>>, vector<1x32x96xf32>
    %204 = vector.shape_cast %203 : vector<1x32x96xf32> to vector<32x96xf32>
    %cst_93 = arith.constant dense<0.000000e+00> : vector<10x96xf32>
    %205 = tpu.matmul %202, %204, %cst_93 {dimension_numbers = #tpu.dot_dimension_numbers<[1], [0], [0], [1], [0, 0, 1, 1], [], []>} : vector<10x32xf32>, vector<32x96xf32>, vector<10x96xf32> -> vector<10x96xf32>
    %c1_94 = arith.constant 1 : index
    %c0_95 = arith.constant 0 : index
    %c0_96 = arith.constant 0 : index
    %206 = vector.load %arg6[%c1_94, %c0_95, %c0_96] : memref<2x1x96xf32, #tpu.memory_space<vmem>>, vector<1x1x96xf32>
    %207 = vector.shape_cast %206 : vector<1x1x96xf32> to vector<1x96xf32>
    %208 = vector.broadcast %207 : vector<1x96xf32> to vector<10x96xf32>
    %209 = arith.addf %205, %208 : vector<10x96xf32>
    %210 = vector.extract_strided_slice %209 {offsets = [0, 0], sizes = [10, 8], strides = [1, 1]} : vector<10x96xf32> to vector<10x8xf32>
    %211 = vector.extract_strided_slice %209 {offsets = [0, 32], sizes = [10, 8], strides = [1, 1]} : vector<10x96xf32> to vector<10x8xf32>
    %212 = vector.extract_strided_slice %209 {offsets = [0, 64], sizes = [10, 8], strides = [1, 1]} : vector<10x96xf32> to vector<10x8xf32>
    "tpu.trace_start"() <{level = 10 : i32, message = "ne,me->nm"}> : () -> ()
    %cst_97 = arith.constant dense<0.000000e+00> : vector<10x10xf32>
    %213 = tpu.matmul %210, %211, %cst_97 {dimension_numbers = #tpu.dot_dimension_numbers<[1], [1], [0], [0], [0, 0, 1, 0], [], []>} : vector<10x8xf32>, vector<10x8xf32>, vector<10x10xf32> -> vector<10x10xf32>
    "tpu.trace_stop"() : () -> ()
    %214 = arith.addf %213, %27 : vector<10x10xf32>
    %cst_98 = arith.constant dense<0xFF800000> : vector<10xf32>
    %215 = vector.multi_reduction <maximumf>, %214, %cst_98 [1] : vector<10x10xf32> to vector<10xf32>
    %216 = vector.shape_cast %215 : vector<10xf32> to vector<10x1xf32>
    %217 = vector.broadcast %216 : vector<10x1xf32> to vector<10x10xf32>
    %218 = arith.subf %214, %217 : vector<10x10xf32>
    %219 = math.exp %218 : vector<10x10xf32>
    %cst_99 = arith.constant dense<0.000000e+00> : vector<10xf32>
    %220 = vector.multi_reduction <add>, %219, %cst_99 [1] : vector<10x10xf32> to vector<10xf32>
    %221 = vector.shape_cast %220 : vector<10xf32> to vector<10x1xf32>
    %222 = tpu.reciprocal %221 {approx = true} : vector<10x1xf32> -> vector<10x1xf32>
    %223 = vector.broadcast %222 : vector<10x1xf32> to vector<10x10xf32>
    %224 = arith.mulf %219, %223 : vector<10x10xf32>
    %cst_100 = arith.constant dense<0.000000e+00> : vector<10x8xf32>
    %225 = tpu.matmul %224, %212, %cst_100 {dimension_numbers = #tpu.dot_dimension_numbers<[1], [0], [0], [1], [0, 0, 1, 1], [], []>} : vector<10x10xf32>, vector<10x8xf32>, vector<10x8xf32> -> vector<10x8xf32>
    %226 = vector.extract_strided_slice %209 {offsets = [0, 8], sizes = [10, 8], strides = [1, 1]} : vector<10x96xf32> to vector<10x8xf32>
    %227 = vector.extract_strided_slice %209 {offsets = [0, 40], sizes = [10, 8], strides = [1, 1]} : vector<10x96xf32> to vector<10x8xf32>
    %228 = vector.extract_strided_slice %209 {offsets = [0, 72], sizes = [10, 8], strides = [1, 1]} : vector<10x96xf32> to vector<10x8xf32>
    "tpu.trace_start"() <{level = 10 : i32, message = "ne,me->nm"}> : () -> ()
    %cst_101 = arith.constant dense<0.000000e+00> : vector<10x10xf32>
    %229 = tpu.matmul %226, %227, %cst_101 {dimension_numbers = #tpu.dot_dimension_numbers<[1], [1], [0], [0], [0, 0, 1, 0], [], []>} : vector<10x8xf32>, vector<10x8xf32>, vector<10x10xf32> -> vector<10x10xf32>
    "tpu.trace_stop"() : () -> ()
    %230 = arith.addf %229, %27 : vector<10x10xf32>
    %cst_102 = arith.constant dense<0xFF800000> : vector<10xf32>
    %231 = vector.multi_reduction <maximumf>, %230, %cst_102 [1] : vector<10x10xf32> to vector<10xf32>
    %232 = vector.shape_cast %231 : vector<10xf32> to vector<10x1xf32>
    %233 = vector.broadcast %232 : vector<10x1xf32> to vector<10x10xf32>
    %234 = arith.subf %230, %233 : vector<10x10xf32>
    %235 = math.exp %234 : vector<10x10xf32>
    %cst_103 = arith.constant dense<0.000000e+00> : vector<10xf32>
    %236 = vector.multi_reduction <add>, %235, %cst_103 [1] : vector<10x10xf32> to vector<10xf32>
    %237 = vector.shape_cast %236 : vector<10xf32> to vector<10x1xf32>
    %238 = tpu.reciprocal %237 {approx = true} : vector<10x1xf32> -> vector<10x1xf32>
    %239 = vector.broadcast %238 : vector<10x1xf32> to vector<10x10xf32>
    %240 = arith.mulf %235, %239 : vector<10x10xf32>
    %cst_104 = arith.constant dense<0.000000e+00> : vector<10x8xf32>
    %241 = tpu.matmul %240, %228, %cst_104 {dimension_numbers = #tpu.dot_dimension_numbers<[1], [0], [0], [1], [0, 0, 1, 1], [], []>} : vector<10x10xf32>, vector<10x8xf32>, vector<10x8xf32> -> vector<10x8xf32>
    %242 = vector.extract_strided_slice %209 {offsets = [0, 16], sizes = [10, 8], strides = [1, 1]} : vector<10x96xf32> to vector<10x8xf32>
    %243 = vector.extract_strided_slice %209 {offsets = [0, 48], sizes = [10, 8], strides = [1, 1]} : vector<10x96xf32> to vector<10x8xf32>
    %244 = vector.extract_strided_slice %209 {offsets = [0, 80], sizes = [10, 8], strides = [1, 1]} : vector<10x96xf32> to vector<10x8xf32>
    "tpu.trace_start"() <{level = 10 : i32, message = "ne,me->nm"}> : () -> ()
    %cst_105 = arith.constant dense<0.000000e+00> : vector<10x10xf32>
    %245 = tpu.matmul %242, %243, %cst_105 {dimension_numbers = #tpu.dot_dimension_numbers<[1], [1], [0], [0], [0, 0, 1, 0], [], []>} : vector<10x8xf32>, vector<10x8xf32>, vector<10x10xf32> -> vector<10x10xf32>
    "tpu.trace_stop"() : () -> ()
    %246 = arith.addf %245, %27 : vector<10x10xf32>
    %cst_106 = arith.constant dense<0xFF800000> : vector<10xf32>
    %247 = vector.multi_reduction <maximumf>, %246, %cst_106 [1] : vector<10x10xf32> to vector<10xf32>
    %248 = vector.shape_cast %247 : vector<10xf32> to vector<10x1xf32>
    %249 = vector.broadcast %248 : vector<10x1xf32> to vector<10x10xf32>
    %250 = arith.subf %246, %249 : vector<10x10xf32>
    %251 = math.exp %250 : vector<10x10xf32>
    %cst_107 = arith.constant dense<0.000000e+00> : vector<10xf32>
    %252 = vector.multi_reduction <add>, %251, %cst_107 [1] : vector<10x10xf32> to vector<10xf32>
    %253 = vector.shape_cast %252 : vector<10xf32> to vector<10x1xf32>
    %254 = tpu.reciprocal %253 {approx = true} : vector<10x1xf32> -> vector<10x1xf32>
    %255 = vector.broadcast %254 : vector<10x1xf32> to vector<10x10xf32>
    %256 = arith.mulf %251, %255 : vector<10x10xf32>
    %cst_108 = arith.constant dense<0.000000e+00> : vector<10x8xf32>
    %257 = tpu.matmul %256, %244, %cst_108 {dimension_numbers = #tpu.dot_dimension_numbers<[1], [0], [0], [1], [0, 0, 1, 1], [], []>} : vector<10x10xf32>, vector<10x8xf32>, vector<10x8xf32> -> vector<10x8xf32>
    %258 = vector.extract_strided_slice %209 {offsets = [0, 24], sizes = [10, 8], strides = [1, 1]} : vector<10x96xf32> to vector<10x8xf32>
    %259 = vector.extract_strided_slice %209 {offsets = [0, 56], sizes = [10, 8], strides = [1, 1]} : vector<10x96xf32> to vector<10x8xf32>
    %260 = vector.extract_strided_slice %209 {offsets = [0, 88], sizes = [10, 8], strides = [1, 1]} : vector<10x96xf32> to vector<10x8xf32>
    "tpu.trace_start"() <{level = 10 : i32, message = "ne,me->nm"}> : () -> ()
    %cst_109 = arith.constant dense<0.000000e+00> : vector<10x10xf32>
    %261 = tpu.matmul %258, %259, %cst_109 {dimension_numbers = #tpu.dot_dimension_numbers<[1], [1], [0], [0], [0, 0, 1, 0], [], []>} : vector<10x8xf32>, vector<10x8xf32>, vector<10x10xf32> -> vector<10x10xf32>
    "tpu.trace_stop"() : () -> ()
    %262 = arith.addf %261, %27 : vector<10x10xf32>
    %cst_110 = arith.constant dense<0xFF800000> : vector<10xf32>
    %263 = vector.multi_reduction <maximumf>, %262, %cst_110 [1] : vector<10x10xf32> to vector<10xf32>
    %264 = vector.shape_cast %263 : vector<10xf32> to vector<10x1xf32>
    %265 = vector.broadcast %264 : vector<10x1xf32> to vector<10x10xf32>
    %266 = arith.subf %262, %265 : vector<10x10xf32>
    %267 = math.exp %266 : vector<10x10xf32>
    %cst_111 = arith.constant dense<0.000000e+00> : vector<10xf32>
    %268 = vector.multi_reduction <add>, %267, %cst_111 [1] : vector<10x10xf32> to vector<10xf32>
    %269 = vector.shape_cast %268 : vector<10xf32> to vector<10x1xf32>
    %270 = tpu.reciprocal %269 {approx = true} : vector<10x1xf32> -> vector<10x1xf32>
    %271 = vector.broadcast %270 : vector<10x1xf32> to vector<10x10xf32>
    %272 = arith.mulf %267, %271 : vector<10x10xf32>
    %cst_112 = arith.constant dense<0.000000e+00> : vector<10x8xf32>
    %273 = tpu.matmul %272, %260, %cst_112 {dimension_numbers = #tpu.dot_dimension_numbers<[1], [0], [0], [1], [0, 0, 1, 1], [], []>} : vector<10x10xf32>, vector<10x8xf32>, vector<10x8xf32> -> vector<10x8xf32>
    %274 = tpu.concatenate %225, %241, %257, %273 in 1 : vector<10x8xf32>, vector<10x8xf32>, vector<10x8xf32>, vector<10x8xf32> -> vector<10x32xf32>
    %c1_113 = arith.constant 1 : index
    %c0_114 = arith.constant 0 : index
    %c0_115 = arith.constant 0 : index
    %275 = vector.load %arg7[%c1_113, %c0_114, %c0_115] : memref<2x32x32xf32, #tpu.memory_space<vmem>>, vector<1x32x32xf32>
    %276 = vector.shape_cast %275 : vector<1x32x32xf32> to vector<32x32xf32>
    %cst_116 = arith.constant dense<0.000000e+00> : vector<10x32xf32>
    %277 = tpu.matmul %274, %276, %cst_116 {dimension_numbers = #tpu.dot_dimension_numbers<[1], [0], [0], [1], [0, 0, 1, 1], [], []>} : vector<10x32xf32>, vector<32x32xf32>, vector<10x32xf32> -> vector<10x32xf32>
    %278 = arith.addf %178, %277 : vector<10x32xf32>
    %c1_117 = arith.constant 1 : index
    %c2_118 = arith.constant 2 : index
    %c0_119 = arith.constant 0 : index
    %279 = vector.load %arg8[%c1_117, %c2_118, %c0_119] : memref<2x6x32xf32, #tpu.memory_space<vmem>>, vector<1x1x32xf32>
    %280 = vector.shape_cast %279 : vector<1x1x32xf32> to vector<1x32xf32>
    %281 = vector.broadcast %280 : vector<1x32xf32> to vector<10x32xf32>
    %282 = arith.addf %278, %281 : vector<10x32xf32>
    %c1_120 = arith.constant 1 : index
    %c3_121 = arith.constant 3 : index
    %c0_122 = arith.constant 0 : index
    %283 = vector.load %arg8[%c1_120, %c3_121, %c0_122] : memref<2x6x32xf32, #tpu.memory_space<vmem>>, vector<1x1x32xf32>
    %284 = vector.shape_cast %283 : vector<1x1x32xf32> to vector<1x32xf32>
    %c1_123 = arith.constant 1 : index
    %c4_124 = arith.constant 4 : index
    %c0_125 = arith.constant 0 : index
    %285 = vector.load %arg8[%c1_123, %c4_124, %c0_125] : memref<2x6x32xf32, #tpu.memory_space<vmem>>, vector<1x1x32xf32>
    %286 = vector.shape_cast %285 : vector<1x1x32xf32> to vector<1x32xf32>
    %cst_126 = arith.constant dense<0.000000e+00> : vector<10xf32>
    %287 = vector.multi_reduction <add>, %282, %cst_126 [1] : vector<10x32xf32> to vector<10xf32>
    %288 = vector.shape_cast %287 : vector<10xf32> to vector<10x1xf32>
    %cst_127 = arith.constant 3.200000e+01 : f32
    %289 = vector.broadcast %cst_127 : f32 to vector<10x1xf32>
    %290 = arith.divf %288, %289 : vector<10x1xf32>
    %291 = vector.broadcast %290 : vector<10x1xf32> to vector<10x32xf32>
    %292 = arith.subf %282, %291 : vector<10x32xf32>
    %293 = arith.mulf %292, %292 : vector<10x32xf32>
    %cst_128 = arith.constant dense<0.000000e+00> : vector<10xf32>
    %294 = vector.multi_reduction <add>, %293, %cst_128 [1] : vector<10x32xf32> to vector<10xf32>
    %295 = vector.shape_cast %294 : vector<10xf32> to vector<10x1xf32>
    %cst_129 = arith.constant 3.200000e+01 : f32
    %296 = vector.broadcast %cst_129 : f32 to vector<10x1xf32>
    %297 = arith.divf %295, %296 : vector<10x1xf32>
    %cst_130 = arith.constant 9.99999974E-6 : f32
    %298 = vector.broadcast %cst_130 : f32 to vector<10x1xf32>
    %299 = arith.addf %297, %298 : vector<10x1xf32>
    %300 = math.rsqrt %299 : vector<10x1xf32>
    %301 = vector.broadcast %300 : vector<10x1xf32> to vector<10x32xf32>
    %302 = arith.mulf %292, %301 : vector<10x32xf32>
    %303 = vector.broadcast %284 : vector<1x32xf32> to vector<10x32xf32>
    %304 = arith.mulf %302, %303 : vector<10x32xf32>
    %305 = vector.broadcast %286 : vector<1x32xf32> to vector<10x32xf32>
    %306 = arith.addf %304, %305 : vector<10x32xf32>
    %c1_131 = arith.constant 1 : index
    %c0_132 = arith.constant 0 : index
    %c0_133 = arith.constant 0 : index
    %307 = vector.load %arg9[%c1_131, %c0_132, %c0_133] : memref<2x32x128xf32, #tpu.memory_space<vmem>>, vector<1x32x128xf32>
    %308 = vector.shape_cast %307 : vector<1x32x128xf32> to vector<32x128xf32>
    %cst_134 = arith.constant dense<0.000000e+00> : vector<10x128xf32>
    %309 = tpu.matmul %306, %308, %cst_134 {dimension_numbers = #tpu.dot_dimension_numbers<[1], [0], [0], [1], [0, 0, 1, 1], [], []>} : vector<10x32xf32>, vector<32x128xf32>, vector<10x128xf32> -> vector<10x128xf32>
    %c1_135 = arith.constant 1 : index
    %c0_136 = arith.constant 0 : index
    %c0_137 = arith.constant 0 : index
    %310 = vector.load %arg10[%c1_135, %c0_136, %c0_137] : memref<2x1x128xf32, #tpu.memory_space<vmem>>, vector<1x1x128xf32>
    %311 = vector.shape_cast %310 : vector<1x1x128xf32> to vector<1x128xf32>
    %312 = vector.broadcast %311 : vector<1x128xf32> to vector<10x128xf32>
    %313 = arith.addf %309, %312 : vector<10x128xf32>
    %cst_138 = arith.constant 1.702000e+00 : f32
    %314 = vector.broadcast %cst_138 : f32 to vector<10x128xf32>
    %315 = arith.mulf %314, %313 : vector<10x128xf32>
    %316 = arith.negf %315 : vector<10x128xf32>
    %317 = math.exp %316 : vector<10x128xf32>
    %cst_139 = arith.constant 1.000000e+00 : f32
    %318 = vector.broadcast %cst_139 : f32 to vector<10x128xf32>
    %319 = arith.addf %318, %317 : vector<10x128xf32>
    %320 = arith.divf %318, %319 : vector<10x128xf32>
    %321 = arith.mulf %313, %320 : vector<10x128xf32>
    %c1_140 = arith.constant 1 : index
    %c0_141 = arith.constant 0 : index
    %c0_142 = arith.constant 0 : index
    %322 = vector.load %arg11[%c1_140, %c0_141, %c0_142] : memref<2x128x32xf32, #tpu.memory_space<vmem>>, vector<1x128x32xf32>
    %323 = vector.shape_cast %322 : vector<1x128x32xf32> to vector<128x32xf32>
    %cst_143 = arith.constant dense<0.000000e+00> : vector<10x32xf32>
    %324 = tpu.matmul %321, %323, %cst_143 {dimension_numbers = #tpu.dot_dimension_numbers<[1], [0], [0], [1], [0, 0, 1, 1], [], []>} : vector<10x128xf32>, vector<128x32xf32>, vector<10x32xf32> -> vector<10x32xf32>
    %325 = arith.addf %282, %324 : vector<10x32xf32>
    %c1_144 = arith.constant 1 : index
    %c5_145 = arith.constant 5 : index
    %c0_146 = arith.constant 0 : index
    %326 = vector.load %arg8[%c1_144, %c5_145, %c0_146] : memref<2x6x32xf32, #tpu.memory_space<vmem>>, vector<1x1x32xf32>
    %327 = vector.shape_cast %326 : vector<1x1x32xf32> to vector<1x32xf32>
    %328 = vector.broadcast %327 : vector<1x32xf32> to vector<10x32xf32>
    %329 = arith.addf %325, %328 : vector<10x32xf32>
    %330 = vector.extract_strided_slice %329 {offsets = [0, 0], sizes = [1, 32], strides = [1, 1]} : vector<10x32xf32> to vector<1x32xf32>
    %331 = vector.extract_strided_slice %329 {offsets = [5, 0], sizes = [1, 32], strides = [1, 1]} : vector<10x32xf32> to vector<1x32xf32>
    %332 = tpu.concatenate %330, %331 in 0 : vector<1x32xf32>, vector<1x32xf32> -> vector<2x32xf32>
    %c2_147 = arith.constant 2 : index
    %c0_148 = arith.constant 0 : index
    %333 = vector.load %arg3[%c2_147, %c0_148] : memref<4x32xf32, #tpu.memory_space<vmem>>, vector<1x32xf32>
    %c3_149 = arith.constant 3 : index
    %c0_150 = arith.constant 0 : index
    %334 = vector.load %arg3[%c3_149, %c0_150] : memref<4x32xf32, #tpu.memory_space<vmem>>, vector<1x32xf32>
    %cst_151 = arith.constant dense<0.000000e+00> : vector<2xf32>
    %335 = vector.multi_reduction <add>, %332, %cst_151 [1] : vector<2x32xf32> to vector<2xf32>
    %336 = vector.shape_cast %335 : vector<2xf32> to vector<2x1xf32>
    %cst_152 = arith.constant 3.200000e+01 : f32
    %337 = vector.broadcast %cst_152 : f32 to vector<2x1xf32>
    %338 = arith.divf %336, %337 : vector<2x1xf32>
    %339 = vector.broadcast %338 : vector<2x1xf32> to vector<2x32xf32>
    %340 = arith.subf %332, %339 : vector<2x32xf32>
    %341 = arith.mulf %340, %340 : vector<2x32xf32>
    %cst_153 = arith.constant dense<0.000000e+00> : vector<2xf32>
    %342 = vector.multi_reduction <add>, %341, %cst_153 [1] : vector<2x32xf32> to vector<2xf32>
    %343 = vector.shape_cast %342 : vector<2xf32> to vector<2x1xf32>
    %cst_154 = arith.constant 3.200000e+01 : f32
    %344 = vector.broadcast %cst_154 : f32 to vector<2x1xf32>
    %345 = arith.divf %343, %344 : vector<2x1xf32>
    %cst_155 = arith.constant 9.99999974E-6 : f32
    %346 = vector.broadcast %cst_155 : f32 to vector<2x1xf32>
    %347 = arith.addf %345, %346 : vector<2x1xf32>
    %348 = math.rsqrt %347 : vector<2x1xf32>
    %349 = vector.broadcast %348 : vector<2x1xf32> to vector<2x32xf32>
    %350 = arith.mulf %340, %349 : vector<2x32xf32>
    %351 = vector.broadcast %333 : vector<1x32xf32> to vector<2x32xf32>
    %352 = arith.mulf %350, %351 : vector<2x32xf32>
    %353 = vector.broadcast %334 : vector<1x32xf32> to vector<2x32xf32>
    %354 = arith.addf %352, %353 : vector<2x32xf32>
    %c0_156 = arith.constant 0 : index
    %c0_157 = arith.constant 0 : index
    %355 = vector.load %arg12[%c0_156, %c0_157] : memref<32x16xf32, #tpu.memory_space<vmem>>, vector<32x16xf32>
    %cst_158 = arith.constant dense<0.000000e+00> : vector<2x16xf32>
    %356 = tpu.matmul %354, %355, %cst_158 {dimension_numbers = #tpu.dot_dimension_numbers<[1], [0], [0], [1], [0, 0, 1, 1], [], []>} : vector<2x32xf32>, vector<32x16xf32>, vector<2x16xf32> -> vector<2x16xf32>
    %c0_159 = arith.constant 0 : index
    %c0_160 = arith.constant 0 : index
    %357 = vector.load %arg13[%c0_159, %c0_160] : memref<2x16xf32, #tpu.memory_space<vmem>>, vector<2x16xf32>
    tpu.vector_store %arg13[%c0_159, %c0_160], %356 {strides = array<i32>} : memref<2x16xf32, #tpu.memory_space<vmem>>, vector<2x16xf32>,
    return
  }
}

</mosaic_0001>

<bundles_post_ra>
// kernel: tpu_custom_call.1
= control target key start
LH: loop header
LB: loop body
LE: loop exit
PB: predicated region body
PF: predicated region fallthrough
CT: control target
= control target key end

     0   :  { %v3955_v3 = vmov 0.0|0.0   ;;  %vm75_vm0 = vcmask 523264   ;;  %s4762_s0 = inlined_call_operand.vmem [shape: f32[10,192], index: 0, kind: input, shape index: {}]   ;;  %s4763_s1 = inlined_call_operand.vmem [shape: f32[192,32], index: 1, kind: input, shape index: {}]   ;;  %s4764_s2 = inlined_call_operand.vmem [shape: f32[10,32], index: 2, kind: input, shape index: {}]   ;;  %s4765_s3 = inlined_call_operand.vmem [shape: f32[4,32], index: 3, kind: input, shape index: {}]   ;;  %s4766_s4 = inlined_call_operand.vmem [shape: f32[10,10], index: 4, kind: input, shape index: {}]   ;;  %s4767_s5 = inlined_call_operand.vmem [shape: f32[2,32,96], index: 5, kind: input, shape index: {}]   ;;  %s4768_s6 = inlined_call_operand.vmem [shape: f32[2,1,96], index: 6, kind: input, shape index: {}]   ;;  %s4769_s7 = inlined_call_operand.vmem [shape: f32[2,32,32], index: 7, kind: input, shape index: {}]   ;;  %s4770_s8 = inlined_call_operand.vmem [shape: f32[2,6,32], index: 8, kind: input, shape index: {}]   ;;  %s4771_s9 = inlined_call_operand.vmem [shape: f32[2,32,128], index: 9, kind: input, shape index: {}]   ;;  %s4772_s10 = inlined_call_operand.vmem [shape: f32[2,1,128], index: 10, kind: input, shape index: {}]   ;;  %s4773_s11 = inlined_call_operand.vmem [shape: f32[2,128,32], index: 11, kind: input, shape index: {}]   ;;  %s4774_s12 = inlined_call_operand.vmem [shape: f32[32,16], index: 12, kind: input, shape index: {}]   ;;  %s4775_s13 = inlined_call_operand.hbm [shape: f32[2,16], index: 13, kind: output, shape index: {}]  }
   0x1   :  { %v49_v0 = vld [vmem:[%s4763_s1] sm:$0xff]  ;;  %v50_v1 = vld [vmem:[%s4763_s1 + $0x8] sm:$0xff]  ;;  %v51_v2 = vld [vmem:[%s4763_s1 + $0x10] sm:$0xff]  ;;  %3478 = vmatprep.subr.bf16.mxu0 %v3955_v3 }
   0x2   :  { %v3479_v4 = vpack.c.bf16 %v50_v1, %v49_v0  ;;  %v52_v5 = vld [vmem:[%s4763_s1 + $0x18] sm:$0xff]  ;;  %v53_v7 = vld [vmem:[%s4763_s1 + $0x20] sm:$0xff]  ;;  %v54_v8 = vld [vmem:[%s4763_s1 + $0x28] sm:$0xff] }
   0x3   :  { %v3482_v6 = vpack.c.bf16 %v52_v5, %v51_v2  ;;  %v3485_v9 = vpack.c.bf16 %v54_v8, %v53_v7  ;;  %v55_v10 = vld [vmem:[%s4763_s1 + $0x30] sm:$0xff]  ;;  %v56_v11 = vld [vmem:[%s4763_s1 + $0x38] sm:$0xff]  ;;  %v46_v12 = vld [vmem:[%s4762_s0 + $0x8] sm:$0xff] }
   0x4   :  { %3480 = vmatpush1.bf16.msra.mxu0 %v3479_v4  ;;  %2947 = vmatprep.mubr.msk.f32.mxu0 %vm75_vm0, %v46_v12 }
   0x5   :  { %3481 = vmatprep.subr.bf16.mxu0 %v3955_v3 }
   0x8   :  { %3483 = vmatpush1.bf16.msra.mxu0 %v3482_v6 }
   0x9   :  { %3484 = vmatprep.subr.bf16.mxu0 %v3955_v3 }
   0xa   :  { %18 = vsyncpa [#allocation3], 0  ;;  %v3488_v13 = vpack.c.bf16 %v56_v11, %v55_v10  ;;  %v57_v14 = vld [vmem:[%s4763_s1 + $0x40] sm:$0xff]  ;;  %v58_v15 = vld [vmem:[%s4763_s1 + $0x48] sm:$0xff]  ;;  %vm159_vm1 = vcmask 261120   ;;  %vm163_vm2 = vcmask 254976  }
   0xb   :  { %v3491_v16 = vpack.c.bf16 %v58_v15, %v57_v14  ;;  %v59_v17 = vld [vmem:[%s4763_s1 + $0x50] sm:$0xff]  ;;  %v60_v18 = vld [vmem:[%s4763_s1 + $0x58] sm:$0xff]  ;;  %v61_v20 = vld [vmem:[%s4763_s1 + $0x60] sm:$0xff]  ;;  %vm340_vm3 = vcmask 64512   ;;  %s3956_s14 = smov 88   ;;  %s3957_s15 = smov 96  }
   0xc   :  { %3486 = vmatpush1.bf16.msra.mxu0 %v3485_v9  ;;  %v3494_v19 = vpack.c.bf16 %v60_v18, %v59_v17  ;;  %v62_v21 = vld [vmem:[%s4763_s1 + $0x68] sm:$0xff]  ;;  %v63_v23 = vld [vmem:[%s4763_s1 + $0x70] sm:$0xff]  ;;  %v64_v24 = vld [vmem:[%s4763_s1 + $0x78] sm:$0xff]  ;;  %vm428_vm5 = vcmask 74752   ;;  %vm424_vm6 = vcmask 80896   ;;  %s3959_s19 = smov 80  }
   0xd   :  { %3487 = vmatprep.subr.bf16.mxu0 %v3955_v3  ;;  %v3497_v22 = vpack.c.bf16 %v62_v21, %v61_v20  ;;  %v3500_v25 = vpack.c.bf16 %v64_v24, %v63_v23  ;;  %v65_v26 = vld [vmem:[%s4763_s1 + $0x80] sm:$0xff]  ;;  %v66_v27 = vld [vmem:[%s4763_s1 + $0x88] sm:$0xff]  ;;  %v67_v29 = vld [vmem:[%s4763_s1 + $0x90] sm:$0xff]  ;;  %s3960_s20 = smov 112   ;;  %s3961_s21 = smov 56   ;;  %vm459_vm7 = vcmask 1041408  }
   0xe   :  { %v3503_v28 = vpack.c.bf16 %v66_v27, %v65_v26  ;;  %v68_v30 = vld [vmem:[%s4763_s1 + $0x98] sm:$0xff]  ;;  %v69_v32 = vld [vmem:[%s4763_s1 + $0xa0] sm:$0xff]  ;;  %v70_v33 = vld [vmem:[%s4763_s1 + $0xa8] sm:$0xff]  ;;  %vm3962_vm8 = vmmov 1   ;;  %s3963_s22 = smov 72   ;;  %s3964_s23 = smov 104  }
   0xf   :  { %v3506_v31 = vpack.c.bf16 %v68_v30, %v67_v29  ;;  %v3509_v34 = vpack.c.bf16 %v70_v33, %v69_v32  ;;  %v71_v35 = vld [vmem:[%s4763_s1 + $0xb0] sm:$0xff]  ;;  %v72_v36 = vld [vmem:[%s4763_s1 + $0xb8] sm:$0xff]  ;;  %v45_v38 = vld [vmem:[%s4762_s0] sm:$0xff]  ;;  %s3965_s24 = smov 48   ;;  %s3966_s25 = smov 40   ;;  %vm1166_vm10 = vcmask 130048  }
  0x10   :  { %3489 = vmatpush1.bf16.msra.mxu0 %v3488_v13  ;;  %v3512_v37 = vpack.c.bf16 %v72_v36, %v71_v35  ;;  %v48_v39 = vld [vmem:[%s4762_s0 + $0x18] sm:$0x3]  ;;  %v47_v40 = vld [vmem:[%s4762_s0 + $0x10] sm:$0x3]  ;;  %v73_v41 = vld [vmem:[%s4764_s2] sm:$0xff]  ;;  %s3958_s0 = smov 120  }
  0x11   :  { %3490 = vmatprep.subr.bf16.mxu0 %v3955_v3  ;;  %v74_v45 = vld [vmem:[%s4764_s2 + $0x8] sm:$0x3]  ;;  %v2949_v5 = vld [vmem:[%s4765_s3] ss:$0 sm:$0xff]  ;;  %v2950_v7 = vld [vmem:[%s4765_s3 + $0x1] ss:$0 sm:$0xff] }
  0x12   :  { %v242_v26 = vld [vmem:[%s4767_s5] sm:$0xff]  ;;  %v243_v27 = vld [vmem:[%s4767_s5 + $0x8] sm:$0xff]  ;;  %v244_v29 = vld [vmem:[%s4767_s5 + $0x10] sm:$0xff]  ;;  %s3967_s26 = smov 64   ;;  %s3968_s27 = smov 8   ;;  %vm1169_vm11 = vcmask 195584  }
  0x13   :  { %v245_v30 = vld [vmem:[%s4767_s5 + $0x18] sm:$0xff]  ;;  %vm4213_vm4 = vmpackc.low %vm340_vm3, %vm340_vm3  ;;  %s4776_s28 = smov 16   ;;  %s4778_s29 = smov 24   ;;  %vm2827_vm12 = vcmask 1040384   ;;  %vm3971_vm13 = vmmov 0   ;;  %vm2931_vm14 = vcmask 123904  }
  0x14   :  { %3492 = vmatpush1.bf16.msra.mxu0 %v3491_v16  ;;  %vm4257_vm9 = vmpackc.low %vm459_vm7, %vm3962_vm8 }
  0x15   :  { %3493 = vmatprep.subr.bf16.mxu0 %v3955_v3 }
  0x18   :  { %3495 = vmatpush1.bf16.msra.mxu0 %v3494_v19 }
  0x19   :  { %3496 = vmatprep.subr.bf16.mxu0 %v3955_v3 }
  0x1c   :  { %3498 = vmatpush1.bf16.msra.mxu0 %v3497_v22 }
  0x1d   :  { %3499 = vmatprep.subr.bf16.mxu0 %v3955_v3 }
  0x20   :  { %3501 = vmatpush1.bf16.msra.mxu0 %v3500_v25 }
  0x21   :  { %3502 = vmatprep.subr.bf16.mxu0 %v3955_v3 }
  0x24   :  { %3504 = vmatpush1.bf16.msra.mxu0 %v3503_v28  ;;  %v3514_v28 = vpack.c.bf16 %v243_v27, %v242_v26 }
  0x25   :  { %3505 = vmatprep.subr.bf16.mxu0 %v3955_v3 }
  0x28   :  { %3507 = vmatpush1.bf16.msra.mxu0 %v3506_v31  ;;  %v3518_v31 = vpack.c.bf16 %v245_v30, %v244_v29 }
  0x29   :  { %3508 = vmatprep.subr.bf16.mxu0 %v3955_v3 }
  0x2c   :  { %3510 = vmatpush1.bf16.msra.mxu0 %v3509_v34 }
  0x2d   :  { %3511 = vmatprep.subr.bf16.mxu0 %v3955_v3 }
  0x30   :  { %3513 = vmatpush1.bf16.msra.mxu0 %v3512_v37 }
  0x31   :  { %3515 = vmatprep.subr.bf16.mxu0 %v3514_v28 }
  0x33   :  { %147 = vmatmul.mubr.f32.vlgmr.msra.gmra.mrb[0].mxu0 %v45_v38 }
  0x34   :  { %2948 = vmatprep.mubr.msk.f32.mxu0 %vm75_vm0, %v48_v39  ;;  %3517 = vmatpush3.bf16.msra.mxu0 %v3514_v28  ;;  %v2951_v39 = vld [vmem:[%s4770_s8] ss:$0 sm:$0xff] }
  0x35   :  { %3519 = vmatprep.subr.bf16.mxu0 %v3518_v31 }
  0x37   :  { %152 = vmatmul.mubr.f32.gmra.mrb[2].mxu0 %v47_v40 }
  0x38   :  { %3521 = vmatpush3.bf16.msra.mxu0 %v3518_v31 }
 0x106   :  { %v148_v42 = vpop.f32.mrb[0].mxu0 }
 0x107   :  { %v149_v43 = vadd.f32 %v148_v42, %v73_v41  ;;  %v150_v44 = vpop.f32.mrb[1].mxu0  ;;  %v2952_v41 = vld [vmem:[%s4770_s8 + $0x1] ss:$0 sm:$0xff] }
 0x109   :  { %v160_v46 = vsel %vm159_vm1, %v149_v43, 0.0 }
 0x10a   :  { %v153_v47 = vpop.f32.mrb[2].mxu0  ;;  %161 = vadd.xlane.f32.xlu0 %v160_v46 }
 0x10b   :  { %v154_v48 = vadd.f32 %v153_v47, %v74_v45  ;;  %v155_v49 = vpop.f32.mrb[3].mxu0 }
 0x10d   :  { %v164_v50 = vsel %vm163_vm2, %v154_v48, 0.0 }
 0x10e   :  { %165 = vadd.xlane.f32.xlu0 %v164_v50 }
 0x197   :  { %v162_v51 = vpop.xlane.xlu0 %161 }
 0x198   :  { %v168_v52 = vmul.f32 0.03125, %v162_v51 }
 0x19a   :  { %v170_v53 = vsub.f32 %v149_v43, %v168_v52 }
 0x19b   :  { %v166_v54 = vpop.xlane.xlu0 %165 }
 0x19c   :  { %v169_v55 = vmul.f32 0.03125, %v166_v54  ;;  %v172_v56 = vmul.f32 %v170_v53, %v170_v53 }
 0x19e   :  { %v171_v57 = vsub.f32 %v154_v48, %v169_v55  ;;  %v174_v58 = vsel %vm159_vm1, %v172_v56, 0.0  ;;  %v2953_v48 = vld [vmem:[%s4768_s6] ss:$0 sm:$0xff] }
 0x19f   :  { %175 = vadd.xlane.f32.xlu1 %v174_v58 }
 0x1a0   :  { %v173_v59 = vmul.f32 %v171_v57, %v171_v57 }
 0x1a2   :  { %v177_v60 = vsel %vm163_vm2, %v173_v59, 0.0 }
 0x1a3   :  { %178 = vadd.xlane.f32.xlu1 %v177_v60 }
 0x22c   :  { %v176_v61 = vpop.xlane.xlu1 %175 }
 0x22d   :  { %v180_v62 = vmul.f32 0.03125, %v176_v61 }
 0x22f   :  { %v182_v63 = vadd.f32 1e-05, %v180_v62 }
 0x230   :  { %v179_v0 = vpop.xlane.xlu1 %178 }
 0x231   :  { %3827 = vrsqrt.f32 %v182_v63  ;;  %v181_v1 = vmul.f32 0.03125, %v179_v0 }
 0x233   :  { %v183_v2 = vadd.f32 1e-05, %v181_v1 }
 0x235   :  { %3829 = vrsqrt.f32 %v183_v2 }
 0x23b   :  { %v3828_v4 = vpop.eup %3827 }
 0x23c   :  { %v186_v6 = vmul.f32 %v3828_v4, %v170_v53  ;;  %v4236_v4 = vld [vmem:[%s4766_s4 + $0x8] sm:$0x3] }
 0x23e   :  { %v192_v8 = vmul.f32 %v2949_v5, %v186_v6  ;;  %v4241_v6 = vld [vmem:[%s4766_s4] sm:$0xff] }
 0x23f   :  { %v3830_v9 = vpop.eup %3829 }
 0x240   :  { %v4158_v10 = vadd.f32 %v2950_v7, %v192_v8  ;;  %v187_v11 = vmul.f32 %v3830_v9, %v171_v57 }
 0x242   :  { %v204_v12 = vsel %vm159_vm1, %v4158_v10, 0.0  ;;  %v193_v13 = vmul.f32 %v2949_v5, %v187_v11 }
 0x243   :  { %205 = vadd.xlane.f32.xlu0 %v204_v12 }
 0x244   :  { %v4162_v14 = vadd.f32 %v2950_v7, %v193_v13 }
 0x246   :  { %v207_v15 = vsel %vm163_vm2, %v4162_v14, 0.0 }
 0x247   :  { %208 = vadd.xlane.f32.xlu1 %v207_v15 }
 0x2d0   :  { %v206_v16 = vpop.xlane.xlu0 %205 }
 0x2d1   :  { %v210_v17 = vmul.f32 0.03125, %v206_v16 }
 0x2d3   :  { %v212_v18 = vsub.f32 %v4158_v10, %v210_v17 }
 0x2d4   :  { %v209_v19 = vpop.xlane.xlu1 %208 }
 0x2d5   :  { %v211_v20 = vmul.f32 0.03125, %v209_v19  ;;  %v214_v21 = vmul.f32 %v212_v18, %v212_v18 }
 0x2d7   :  { %v213_v22 = vsub.f32 %v4162_v14, %v211_v20  ;;  %v216_v23 = vsel %vm159_vm1, %v214_v21, 0.0 }
 0x2d8   :  { %217 = vadd.xlane.f32.xlu0 %v216_v23 }
 0x2d9   :  { %v215_v24 = vmul.f32 %v213_v22, %v213_v22 }
 0x2db   :  { %v219_v25 = vsel %vm163_vm2, %v215_v24, 0.0 }
 0x2dc   :  { %220 = vadd.xlane.f32.xlu1 %v219_v25 }
 0x365   :  { %v218_v32 = vpop.xlane.xlu0 %217 }
 0x366   :  { %v222_v33 = vmul.f32 0.03125, %v218_v32 }
 0x368   :  { %v224_v34 = vadd.f32 1e-05, %v222_v33 }
 0x369   :  { %v221_v35 = vpop.xlane.xlu1 %220 }
 0x36a   :  { %3831 = vrsqrt.f32 %v224_v34  ;;  %v223_v36 = vmul.f32 0.03125, %v221_v35 }
 0x36c   :  { %v225_v37 = vadd.f32 1e-05, %v223_v36 }
 0x36e   :  { %3833 = vrsqrt.f32 %v225_v37 }
 0x374   :  { %v3832_v38 = vpop.eup %3831 }
 0x375   :  { %v228_v40 = vmul.f32 %v3832_v38, %v212_v18 }
 0x377   :  { %v234_v42 = vmul.f32 %v2951_v39, %v228_v40 }
 0x378   :  { %v3834_v43 = vpop.eup %3833 }
 0x379   :  { %v229_v44 = vmul.f32 %v3834_v43, %v213_v22  ;;  %v240_v45 = vadd.f32 %v2952_v41, %v234_v42 }
 0x37b   :  { %v235_v46 = vmul.f32 %v2951_v39, %v229_v44  ;;  %3227 = vmatprep.mubr.msk.f32.mxu0 %vm159_vm1, %v240_v45 }
 0x37d   :  { %v241_v47 = vadd.f32 %v2952_v41, %v235_v46 }
 0x37f   :  { %3228 = vmatmul.mubr.msk.f32.vlgmr.msra.gmra.mrb[4].mxu0 %vm159_vm1, %v241_v47 }
 0x452   :  { %v3229_v49 = vpop.f32.mrb[4].mxu0 }
 0x453   :  { %v4193_v50 = vadd.f32 %v3229_v49, %v2953_v48  ;;  %v325_v51 = vpop.f32.mrb[5].mxu0 }
 0x454   :  { %v4195_v52 = vadd.f32 %v2953_v48, %v325_v51 }
 0x456   :  { %3234 = vmatprep.mubr.msk.f32.mxu1 %vm340_vm3, %v4195_v52  ;;  %v4201_v53 = vpack.i.bf16 %v4193_v50, %v4195_v52 }
 0x458   :  { %3753 = vrot.lane.b32.xlu1 %v4201_v53, %s3956_s14  ;;  %3748 = vrot.lane.b32.xlu0 %v4201_v53, %s3957_s15 }
 0x45c   :  { %537 = vrot.lane.b32.xlu1 %v4195_v52, %s3958_s0 }
 0x460   :  { %539 = vrot.lane.b32.xlu1 %v4193_v50, %s3958_s0 }
 0x4ca   :  { %v3754_v54 = vpop.permute.xlu1 %3753  ;;  %v3749_v55 = vpop.permute.xlu0 %3748 }
 0x4cb   :  { %v3756_v56 = vunpack.i.h.bf16 %v3754_v54  ;;  %v3755_v57 = vunpack.i.l.bf16 %v3754_v54  ;;  %v3751_v58 = vunpack.i.h.bf16 %v3749_v55  ;;  %v3750_v59 = vunpack.i.l.bf16 %v3749_v55 }
 0x4cd   :  { %v3522_v61 = vpack.c.bf16 %v3751_v58, %v3750_v59  ;;  %v3534_v62 = vpack.c.bf16 %v3756_v56, %v3755_v57 }
 0x4ce   :  { %v538_v63 = vpop.permute.xlu1 %537 }
 0x4cf   :  { %3524 = vmatprep.subr.msk.bf16.mxu1 %vm4213_vm4, %v3522_v61 }
 0x4d0   :  { %3527 = vmatpush3.bf16.xpose.msk.msra.mxu1 %vm4213_vm4, %v3522_v61 }
 0x4d1   :  { %3536 = vmatprep.subr.msk.bf16.mxu1 %vm4213_vm4, %v3534_v62 }
 0x4d2   :  { %v540_v0 = vpop.permute.xlu1 %539 }
 0x4d7   :  { %3235 = vmatmul.mubr.msk.f32.vlgmr.msra.gmra.mrb[0].mxu1 %vm340_vm3, %v4193_v50 }
 0x4d8   :  { %3539 = vmatpush3.bf16.xpose.msk.msra.mxu1 %vm4213_vm4, %v3534_v62  ;;  %3248 = vmatprep.mubr.msk.f32.mxu1 %vm340_vm3, %v538_v63 }
 0x4df   :  { %3249 = vmatmul.mubr.msk.f32.vlgmr.msra.gmra.mrb[2].mxu1 %vm340_vm3, %v540_v0 }
 0x5aa   :  { %v4229_v1 = vpop.f32.mrb[0].mxu1 }
 0x5ab   :  { %v4231_v2 = vpop.f32.mrb[1].mxu1  ;;  %v421_v49 = vadd.f32 %v4229_v1, %v4236_v4 }
 0x5ad   :  { %v429_v51 = vsel %vm428_vm5, %v421_v49, -inf }
 0x5b2   :  { %v3250_v5 = vpop.f32.mrb[2].mxu1 }
 0x5b3   :  { %v625_v7 = vadd.f32 %v3250_v5, %v4236_v4  ;;  %v619_v8 = vpop.f32.mrb[3].mxu1 }
 0x5b4   :  { %v620_v9 = vadd.f32 %v619_v8, %v4241_v6 }
 0x5b5   :  { %v631_v11 = vsel %vm428_vm5, %v625_v7, -inf }
 0x5b6   :  { %632 = vmax.xlane.f32.xlu1 %v631_v11  ;;  %v628_v12 = vsel %vm424_vm6, %v620_v9, -inf }
 0x5b7   :  { %629 = vmax.xlane.f32.xlu0 %v628_v12 }
 0x5c7   :  { %3763 = vrot.lane.b32.xlu1 %v4201_v53, %s3959_s19 }
 0x5cb   :  { %738 = vrot.lane.b32.xlu1 %v4195_v52, %s3960_s20 }
 0x5cf   :  { %740 = vrot.lane.b32.xlu1 %v4193_v50, %s3960_s20 }
 0x643   :  { %v633_v13 = vpop.xlane.xlu1 %632 }
 0x644   :  { %v635_v15 = vsub.f32 %v625_v7, %v633_v13  ;;  %v630_v16 = vpop.xlane.xlu0 %629 }
 0x645   :  { %v634_v17 = vsub.f32 %v620_v9, %v630_v16  ;;  %v416_v9 = vadd.f32 %v4231_v2, %v4241_v6 }
 0x646   :  { %v638_v18 = vmul.f32 1.442695, %v635_v15 }
 0x647   :  { %v636_v19 = vmul.f32 1.442695, %v634_v17  ;;  %v3764_v26 = vpop.permute.xlu1 %3763  ;;  %v425_v11 = vsel %vm424_vm6, %v416_v9, -inf }
 0x648   :  { %3835 = vpow2.f32 %v638_v18  ;;  %v3766_v28 = vunpack.i.h.bf16 %v3764_v26  ;;  %v3765_v29 = vunpack.i.l.bf16 %v3764_v26 }
 0x649   :  { %3837 = vpow2.f32 %v636_v19 }
 0x64a   :  { %v3546_v34 = vpack.c.bf16 %v3766_v28, %v3765_v29 }
 0x64b   :  { %v739_v39 = vpop.permute.xlu1 %738 }
 0x64f   :  { %v741_v40 = vpop.permute.xlu1 %740 }
 0x652   :  { %v3836_v20 = vpop.eup %3835 }
 0x653   :  { %v643_v21 = vsel %vm428_vm5, %v3836_v20, 0.0  ;;  %v3838_v22 = vpop.eup %3837 }
 0x654   :  { %644 = vadd.xlane.f32.xlu0 %v643_v21  ;;  %v640_v23 = vsel %vm424_vm6, %v3838_v22, 0.0 }
 0x658   :  { %641 = vadd.xlane.f32.xlu0 %v640_v23 }
 0x66e   :  { %3758 = vrot.lane.b32.xlu0 %v4201_v53, %s3961_s21 }
 0x6e1   :  { %v645_v24 = vpop.xlane.xlu0 %644 }
 0x6e2   :  { %3839 = vrcp.f32 %v645_v24 }
 0x6e5   :  { %v642_v25 = vpop.xlane.xlu0 %641 }
 0x6e6   :  { %3841 = vrcp.f32 %v642_v25 }
 0x6e9   :  { %v3759_v27 = vpop.permute.xlu0 %3758 }
 0x6ea   :  { %v3761_v30 = vunpack.i.h.bf16 %v3759_v27  ;;  %v3760_v31 = vunpack.i.l.bf16 %v3759_v27 }
 0x6ec   :  { %v3540_v33 = vpack.c.bf16 %v3761_v30, %v3760_v31  ;;  %v3840_v35 = vpop.eup %3839 }
 0x6ed   :  { %v649_v38 = vmul.f32 %v3840_v35, %v3836_v20 }
 0x6ee   :  { %3542 = vmatprep.subr.msk.bf16.mxu1 %vm4257_vm9, %v3540_v33 }
 0x6ef   :  { %3545 = vmatpush3.bf16.msk.msra.mxu1 %vm4257_vm9, %v3540_v33 }
 0x6f0   :  { %v3842_v36 = vpop.eup %3841  ;;  %3548 = vmatprep.subr.msk.bf16.mxu1 %vm4213_vm4, %v3546_v34 }
 0x6f1   :  { %v648_v37 = vmul.f32 %v3842_v36, %v3838_v22 }
 0x6f3   :  { %3255 = vmatprep.mubr.msk.f32.mxu1 %vm424_vm6, %v648_v37 }
 0x6f4   :  { %3256 = vmatmul.mubr.msk.f32.vlgmr.msra.gmra.mrb[4].mxu1 %vm424_vm6, %v649_v38 }
 0x6f5   :  { %3262 = vmatprep.mubr.msk.f32.mxu1 %vm340_vm3, %v739_v39 }
 0x6f8   :  { %3551 = vmatpush3.bf16.xpose.msk.msra.mxu1 %vm4213_vm4, %v3546_v34 }
 0x6ff   :  { %3263 = vmatmul.mubr.msk.f32.vlgmr.msra.gmra.mrb[6].mxu1 %vm340_vm3, %v741_v40 }
 0x7c7   :  { %v4273_v41 = vpop.f32.mrb[4].mxu1 }
 0x7c8   :  { %v4275_v42 = vpop.f32.mrb[5].mxu1 }
 0x7d2   :  { %v3264_v43 = vpop.f32.mrb[6].mxu1 }
 0x7d3   :  { %v826_v44 = vadd.f32 %v3264_v43, %v4236_v4  ;;  %v820_v45 = vpop.f32.mrb[7].mxu1 }
 0x7d4   :  { %v821_v46 = vadd.f32 %v820_v45, %v4241_v6 }
 0x7d5   :  { %v832_v47 = vsel %vm428_vm5, %v826_v44, -inf }
 0x7d6   :  { %833 = vmax.xlane.f32.xlu1 %v832_v47  ;;  %v829_v48 = vsel %vm424_vm6, %v821_v46, -inf }
 0x7d7   :  { %830 = vmax.xlane.f32.xlu0 %v829_v48 }
 0x7e7   :  { %3773 = vrot.lane.b32.xlu1 %v4201_v53, %s3963_s22 }
 0x7eb   :  { %939 = vrot.lane.b32.xlu1 %v4195_v52, %s3964_s23 }
 0x7ef   :  { %941 = vrot.lane.b32.xlu1 %v4193_v50, %s3964_s23 }
 0x813   :  { %430 = vmax.xlane.f32.xlu1 %v429_v51 }
 0x863   :  { %v834_v54 = vpop.xlane.xlu1 %833 }
 0x864   :  { %v836_v55 = vsub.f32 %v826_v44, %v834_v54  ;;  %v831_v56 = vpop.xlane.xlu0 %830 }
 0x865   :  { %v835_v57 = vsub.f32 %v821_v46, %v831_v56 }
 0x866   :  { %v839_v58 = vmul.f32 1.442695, %v836_v55 }
 0x867   :  { %v837_v59 = vmul.f32 1.442695, %v835_v57  ;;  %v3774_v63 = vpop.permute.xlu1 %3773 }
 0x868   :  { %3843 = vpow2.f32 %v839_v58  ;;  %v3776_v18 = vunpack.i.h.bf16 %v3774_v63  ;;  %v3775_v19 = vunpack.i.l.bf16 %v3774_v63 }
 0x869   :  { %3845 = vpow2.f32 %v837_v59 }
 0x86a   :  { %v3558_v2 = vpack.c.bf16 %v3776_v18, %v3775_v19  ;;  %v1175_v18 = vld [vmem:[%s4769_s7 + $0x18] sm:$0xff] }
 0x86b   :  { %v940_v0 = vpop.permute.xlu1 %939 }
 0x86f   :  { %v942_v1 = vpop.permute.xlu1 %941 }
 0x872   :  { %v3844_v61 = vpop.eup %3843 }
 0x873   :  { %v844_v52 = vsel %vm428_vm5, %v3844_v61, 0.0  ;;  %v3846_v62 = vpop.eup %3845 }
 0x874   :  { %845 = vadd.xlane.f32.xlu0 %v844_v52  ;;  %v841_v50 = vsel %vm424_vm6, %v3846_v62, 0.0 }
 0x878   :  { %842 = vadd.xlane.f32.xlu0 %v841_v50 }
 0x88e   :  { %3768 = vrot.lane.b32.xlu0 %v4201_v53, %s3965_s24 }
 0x8a0   :  { %v431_v5 = vpop.xlane.xlu1 %430 }
 0x8a1   :  { %v433_v7 = vsub.f32 %v421_v49, %v431_v5 }
 0x8a3   :  { %v436_v8 = vmul.f32 1.442695, %v433_v7 }
 0x8a5   :  { %3847 = vpow2.f32 %v436_v8 }
 0x8ad   :  { %426 = vmax.xlane.f32.xlu0 %v425_v11 }
 0x8af   :  { %v4297_v12 = vpop.eup %3847 }
 0x8b0   :  { %v441_v13 = vsel %vm428_vm5, %v4297_v12, 0.0 }
 0x8b1   :  { %442 = vadd.xlane.f32.xlu1 %v441_v13 }
 0x901   :  { %v846_v15 = vpop.xlane.xlu0 %845 }
 0x902   :  { %3849 = vrcp.f32 %v846_v15  ;;  %v1173_v15 = vld [vmem:[%s4769_s7 + $0x8] sm:$0xff] }
 0x905   :  { %v843_v16 = vpop.xlane.xlu0 %842 }
 0x906   :  { %3851 = vrcp.f32 %v843_v16  ;;  %v1174_v16 = vld [vmem:[%s4769_s7 + $0x10] sm:$0xff] }
 0x907   :  { %v3574_v19 = vpack.c.bf16 %v1175_v18, %v1174_v16  ;;  %v1414_v18 = vld [vmem:[%s4773_s11] sm:$0xff] }
 0x909   :  { %v3769_v17 = vpop.permute.xlu0 %3768 }
 0x90a   :  { %v3771_v20 = vunpack.i.h.bf16 %v3769_v17  ;;  %v3770_v21 = vunpack.i.l.bf16 %v3769_v17 }
 0x90c   :  { %v3552_v22 = vpack.c.bf16 %v3771_v20, %v3770_v21  ;;  %v3850_v23 = vpop.eup %3849 }
 0x90d   :  { %v850_v26 = vmul.f32 %v3850_v23, %v3844_v61 }
 0x90e   :  { %3554 = vmatprep.subr.msk.bf16.mxu1 %vm4257_vm9, %v3552_v22 }
 0x90f   :  { %3557 = vmatpush3.bf16.msk.msra.mxu1 %vm4257_vm9, %v3552_v22 }
 0x910   :  { %v3852_v24 = vpop.eup %3851  ;;  %3560 = vmatprep.subr.msk.bf16.mxu1 %vm4213_vm4, %v3558_v2 }
 0x911   :  { %v849_v25 = vmul.f32 %v3852_v24, %v3846_v62 }
 0x913   :  { %3269 = vmatprep.mubr.msk.f32.mxu1 %vm424_vm6, %v849_v25 }
 0x914   :  { %3270 = vmatmul.mubr.msk.f32.vlgmr.msra.gmra.mrb[8].mxu1 %vm424_vm6, %v850_v26 }
 0x915   :  { %3276 = vmatprep.mubr.msk.f32.mxu1 %vm340_vm3, %v940_v0 }
 0x918   :  { %3563 = vmatpush3.bf16.xpose.msk.msra.mxu1 %vm4213_vm4, %v3558_v2 }
 0x91f   :  { %3277 = vmatmul.mubr.msk.f32.vlgmr.msra.gmra.mrb[10].mxu1 %vm340_vm3, %v942_v1 }
 0x93a   :  { %v427_v27 = vpop.xlane.xlu0 %426 }
 0x93b   :  { %v432_v30 = vsub.f32 %v416_v9, %v427_v27 }
 0x93d   :  { %v434_v31 = vmul.f32 1.442695, %v432_v30 }
 0x93e   :  { %v443_v59 = vpop.xlane.xlu1 %442 }
 0x93f   :  { %3853 = vpow2.f32 %v434_v31 }
 0x949   :  { %v3854_v39 = vpop.eup %3853 }
 0x94a   :  { %v438_v40 = vsel %vm424_vm6, %v3854_v39, 0.0 }
 0x9e7   :  { %v3271_v28 = vpop.f32.mrb[8].mxu1 }
 0x9e8   :  { %v930_v29 = vpop.f32.mrb[9].mxu1 }
 0x9f2   :  { %v3278_v33 = vpop.f32.mrb[10].mxu1 }
 0x9f3   :  { %v1021_v34 = vpop.f32.mrb[11].mxu1  ;;  %v1027_v36 = vadd.f32 %v3278_v33, %v4236_v4 }
 0x9f4   :  { %v1022_v35 = vadd.f32 %v1021_v34, %v4241_v6 }
 0x9f5   :  { %v1033_v38 = vsel %vm428_vm5, %v1027_v36, -inf }
 0x9f6   :  { %v1030_v37 = vsel %vm424_vm6, %v1022_v35, -inf }
 0x9f7   :  { %1031 = vmax.xlane.f32.xlu0 %v1030_v37  ;;  %v2986_v37 = vld [vmem:[%s4770_s8 + $0x2] ss:$0 sm:$0xff] }
 0x9fb   :  { %1034 = vmax.xlane.f32.xlu0 %v1033_v38 }
 0x9ff   :  { %439 = vadd.xlane.f32.xlu0 %v438_v40 }
 0xa84   :  { %v1032_v43 = vpop.xlane.xlu0 %1031 }
 0xa85   :  { %v1036_v44 = vsub.f32 %v1022_v35, %v1032_v43 }
 0xa87   :  { %v1038_v45 = vmul.f32 1.442695, %v1036_v44 }
 0xa88   :  { %v1035_v46 = vpop.xlane.xlu0 %1034 }
 0xa89   :  { %3855 = vpow2.f32 %v1038_v45  ;;  %v1037_v47 = vsub.f32 %v1027_v36, %v1035_v46 }
 0xa8b   :  { %v1040_v48 = vmul.f32 1.442695, %v1037_v47 }
 0xa8c   :  { %v440_v49 = vpop.xlane.xlu0 %439 }
 0xa8d   :  { %3857 = vpow2.f32 %v1040_v48 }
 0xa8e   :  { %3859 = vrcp.f32 %v440_v49 }
 0xa8f   :  { %3861 = vrcp.f32 %v443_v59  ;;  %v1307_v59 = vld [vmem:[%s4771_s9 + $0x8] sm:$0xff] }
 0xa93   :  { %v3856_v51 = vpop.eup %3855 }
 0xa94   :  { %v1042_v54 = vsel %vm424_vm6, %v3856_v51, 0.0 }
 0xa95   :  { %1043 = vadd.xlane.f32.xlu0 %v1042_v54 }
 0xa97   :  { %v3858_v55 = vpop.eup %3857 }
 0xa98   :  { %v3860_v56 = vpop.eup %3859  ;;  %v1045_v57 = vsel %vm428_vm5, %v3858_v55, 0.0 }
 0xa99   :  { %1046 = vadd.xlane.f32.xlu1 %v1045_v57  ;;  %v446_v58 = vmul.f32 %v3860_v56, %v3854_v39  ;;  %v3862_v0 = vpop.eup %3861 }
 0xa9a   :  { %v447_v7 = vmul.f32 %v3862_v0, %v4297_v12  ;;  %v1172_v12 = vld [vmem:[%s4769_s7] sm:$0xff] }
 0xa9b   :  { %3241 = vmatprep.mubr.msk.f32.mxu0 %vm424_vm6, %v446_v58  ;;  %v3570_v17 = vpack.c.bf16 %v1173_v15, %v1172_v12  ;;  %v1306_v58 = vld [vmem:[%s4771_s9] sm:$0xff] }
 0xa9d   :  { %3571 = vmatprep.subr.bf16.mxu1 %v3570_v17 }
 0xa9e   :  { %3573 = vmatpush3.bf16.msra.mxu1 %v3570_v17 }
 0xa9f   :  { %3575 = vmatprep.subr.bf16.mxu1 %v3574_v19 }
 0xaa2   :  { %3577 = vmatpush3.bf16.msra.mxu1 %v3574_v19  ;;  %v1415_v19 = vld [vmem:[%s4773_s11 + $0x8] sm:$0xff] }
 0xaaa   :  { %3783 = vrot.lane.b32.xlu1 %v4201_v53, %s3966_s25 }
 0xaab   :  { %3778 = vrot.lane.b32.xlu0 %v4201_v53, %s3967_s26 }
 0xaae   :  { %1142 = vrot.lane.b32.xlu1 %v4275_v42, %s3968_s27 }
 0xaaf   :  { %1150 = vrot.lane.b32.xlu0 %v930_v29, %s4776_s28 }
 0xab2   :  { %1144 = vrot.lane.b32.xlu1 %v4273_v41, %s3968_s27 }
 0xab6   :  { %1152 = vrot.lane.b32.xlu1 %v3271_v28, %s4776_s28 }
 0xb22   :  { %v1044_v61 = vpop.xlane.xlu0 %1043 }
 0xb23   :  { %3863 = vrcp.f32 %v1044_v61  ;;  %v3578_v61 = vpack.c.bf16 %v1307_v59, %v1306_v58 }
 0xb26   :  { %v1047_v52 = vpop.xlane.xlu1 %1046  ;;  %v3779_v62 = vpop.permute.xlu0 %3778 }
 0xb27   :  { %3865 = vrcp.f32 %v1047_v52  ;;  %v3781_v53 = vunpack.i.h.bf16 %v3779_v62  ;;  %v3780_v50 = vunpack.i.l.bf16 %v3779_v62  ;;  %v1308_v52 = vld [vmem:[%s4771_s9 + $0x10] sm:$0xff]  ;;  %v1309_v62 = vld [vmem:[%s4771_s9 + $0x18] sm:$0xff] }
 0xb29   :  { %v3528_v63 = vpack.c.bf16 %v3781_v53, %v3780_v50  ;;  %v3582_v53 = vpack.c.bf16 %v1309_v62, %v1308_v52 }
 0xb2a   :  { %v3784_v42 = vpop.permute.xlu1 %3783  ;;  %v1151_v26 = vpop.permute.xlu0 %1150 }
 0xb2b   :  { %v3786_v1 = vunpack.i.h.bf16 %v3784_v42  ;;  %v3785_v5 = vunpack.i.l.bf16 %v3784_v42  ;;  %3530 = vmatprep.subr.msk.bf16.mxu0 %vm4257_vm9, %v3528_v63 }
 0xb2c   :  { %3533 = vmatpush3.bf16.msk.msra.mxu0 %vm4257_vm9, %v3528_v63 }
 0xb2d   :  { %v3864_v41 = vpop.eup %3863  ;;  %v3564_v8 = vpack.c.bf16 %v3786_v1, %v3785_v5 }
 0xb2e   :  { %v1050_v9 = vmul.f32 %v3864_v41, %v3856_v51  ;;  %v1143_v23 = vpop.permute.xlu1 %1142 }
 0xb2f   :  { %3242 = vmatmul.mubr.msk.f32.vlgmr.msra.gmra.mrb[6].mxu0 %vm424_vm6, %v447_v7  ;;  %3566 = vmatprep.subr.msk.bf16.mxu0 %vm4257_vm9, %v3564_v8  ;;  %v2987_v7 = vld [vmem:[%s4770_s8 + $0x3] ss:$0 sm:$0xff] }
 0xb30   :  { %3569 = vmatpush3.bf16.msk.msra.mxu0 %vm4257_vm9, %v3564_v8  ;;  %3283 = vmatprep.mubr.msk.f32.mxu0 %vm424_vm6, %v1050_v9  ;;  %v2988_v9 = vld [vmem:[%s4770_s8 + $0x4] ss:$0 sm:$0xff] }
 0xb31   :  { %v3866_v11 = vpop.eup %3865  ;;  %3579 = vmatprep.subr.bf16.mxu0 %v3578_v61 }
 0xb32   :  { %v1051_v13 = vmul.f32 %v3866_v11, %v3858_v55  ;;  %v1145_v24 = vpop.permute.xlu1 %1144 }
 0xb34   :  { %3284 = vmatmul.mubr.msk.f32.vlgmr.msra.gmra.mrb[8].mxu0 %vm424_vm6, %v1051_v13 }
 0xb35   :  { %3581 = vmatpush3.bf16.msra.mxu0 %v3578_v61 }
 0xb36   :  { %v1153_v25 = vpop.permute.xlu1 %1152  ;;  %3583 = vmatprep.subr.bf16.mxu0 %v3582_v53 }
 0xb39   :  { %3585 = vmatpush3.bf16.msra.mxu0 %v3582_v53 }
 0xc02   :  { %v3243_v20 = vpop.f32.mrb[6].mxu0 }
 0xc03   :  { %v528_v21 = vpop.f32.mrb[7].mxu0  ;;  %v1165_v28 = vsel %vm340_vm3, %v3243_v20, %v1145_v24  ;;  %v3586_v20 = vpack.c.bf16 %v1415_v19, %v1414_v18  ;;  %v1419_v24 = vld [vmem:[%s4773_s11 + $0x28] sm:$0xff]  ;;  %v2999_v19 = vld [vmem:[%s4767_s5 + $0x20] sm:$0xff] }
 0xc04   :  { %v1164_v27 = vsel %vm340_vm3, %v528_v21, %v1143_v23  ;;  %v1168_v33 = vsel %vm1166_vm10, %v1165_v28, %v1153_v25  ;;  %v1416_v21 = vld [vmem:[%s4773_s11 + $0x10] sm:$0xff]  ;;  %v1418_v23 = vld [vmem:[%s4773_s11 + $0x20] sm:$0xff] }
 0xc05   :  { %v1167_v30 = vsel %vm1166_vm10, %v1164_v27, %v1151_v26  ;;  %3587 = vmatprep.subr.bf16.mxu1 %v3586_v20  ;;  %v3594_v25 = vpack.c.bf16 %v1419_v24, %v1418_v23  ;;  %v1420_v26 = vld [vmem:[%s4773_s11 + $0x30] sm:$0xff]  ;;  %v1421_v27 = vld [vmem:[%s4773_s11 + $0x38] sm:$0xff] }
 0xc06   :  { %v3598_v28 = vpack.c.bf16 %v1421_v27, %v1420_v26 }
 0xc07   :  { %v3285_v22 = vpop.f32.mrb[8].mxu0 }
 0xc08   :  { %1160 = vrot.lane.b32.xlu1 %v3285_v22, %s4778_s29  ;;  %v1131_v2 = vpop.f32.mrb[9].mxu0  ;;  %v1417_v22 = vld [vmem:[%s4773_s11 + $0x18] sm:$0xff] }
 0xc09   :  { %1158 = vrot.lane.b32.xlu0 %v1131_v2, %s4778_s29  ;;  %v3590_v2 = vpack.c.bf16 %v1417_v22, %v1416_v21  ;;  %v3001_v22 = vld [vmem:[%s4767_s5 + $0x30] sm:$0xff] }
 0xc7a   :  { %v1161_v29 = vpop.permute.xlu1 %1160 }
 0xc7b   :  { %v1159_v31 = vpop.permute.xlu0 %1158  ;;  %v1171_v35 = vsel %vm1169_vm11, %v1168_v33, %v1161_v29  ;;  %v1422_v29 = vld [vmem:[%s4773_s11 + $0x40] sm:$0xff]  ;;  %v1424_v33 = vld [vmem:[%s4773_s11 + $0x50] sm:$0xff] }
 0xc7c   :  { %v1170_v34 = vsel %vm1169_vm11, %v1167_v30, %v1159_v31  ;;  %v1423_v30 = vld [vmem:[%s4773_s11 + $0x48] sm:$0xff] }
 0xc7d   :  { %3294 = vmatprep.mubr.msk.f32.mxu1 %vm159_vm1, %v1170_v34  ;;  %v3602_v31 = vpack.c.bf16 %v1423_v30, %v1422_v29  ;;  %v1425_v34 = vld [vmem:[%s4773_s11 + $0x58] sm:$0xff] }
 0xc7e   :  { %3295 = vmatmul.mubr.msk.f32.vlgmr.msra.gmra.mrb[12].mxu1 %vm159_vm1, %v1171_v35  ;;  %v3606_v35 = vpack.c.bf16 %v1425_v34, %v1424_v33 }
 0xc7f   :  { %3589 = vmatpush3.bf16.msra.mxu1 %v3586_v20  ;;  %v3000_v20 = vld [vmem:[%s4767_s5 + $0x28] sm:$0xff] }
 0xc80   :  { %3591 = vmatprep.subr.bf16.mxu1 %v3590_v2  ;;  %v3618_v21 = vpack.c.bf16 %v3000_v20, %v2999_v19 }
 0xc82   :  { %3619 = vmatprep.subr.bf16.mxu0 %v3618_v21 }
 0xc83   :  { %3593 = vmatpush3.bf16.msra.mxu1 %v3590_v2  ;;  %v3002_v2 = vld [vmem:[%s4767_s5 + $0x38] sm:$0xff] }
 0xc84   :  { %3595 = vmatprep.subr.bf16.mxu1 %v3594_v25  ;;  %v3622_v23 = vpack.c.bf16 %v3002_v2, %v3001_v22 }
 0xc87   :  { %3597 = vmatpush3.bf16.msra.mxu1 %v3594_v25 }
 0xc88   :  { %3599 = vmatprep.subr.bf16.mxu1 %v3598_v28 }
 0xc8b   :  { %3601 = vmatpush3.bf16.msra.mxu1 %v3598_v28 }
 0xc8c   :  { %3603 = vmatprep.subr.bf16.mxu1 %v3602_v31 }
 0xc8f   :  { %3605 = vmatpush3.bf16.msra.mxu1 %v3602_v31  ;;  %v2997_v31 = vld [vmem:[%s4770_s8 + $0x8] ss:$0 sm:$0xff] }
 0xc90   :  { %3607 = vmatprep.subr.bf16.mxu1 %v3606_v35 }
 0xc93   :  { %3609 = vmatpush3.bf16.msra.mxu1 %v3606_v35 }
 0xd51   :  { %v3296_v36 = vpop.f32.mrb[12].mxu1 }
 0xd52   :  { %v1258_v38 = vadd.f32 %v3296_v36, %v4162_v14  ;;  %v1248_v39 = vpop.f32.mrb[13].mxu1  ;;  %v1426_v36 = vld [vmem:[%s4773_s11 + $0x60] sm:$0xff] }
 0xd53   :  { %v1257_v40 = vadd.f32 %v1248_v39, %v4158_v10  ;;  %v1428_v39 = vld [vmem:[%s4773_s11 + $0x70] sm:$0xff] }
 0xd54   :  { %v4370_v43 = vadd.f32 %v2986_v37, %v1258_v38 }
 0xd55   :  { %v4372_v44 = vadd.f32 %v2986_v37, %v1257_v40  ;;  %v1427_v37 = vld [vmem:[%s4773_s11 + $0x68] sm:$0xff]  ;;  %v1429_v40 = vld [vmem:[%s4773_s11 + $0x78] sm:$0xff] }
 0xd56   :  { %v1271_v45 = vsel %vm163_vm2, %v4370_v43, 0.0  ;;  %v3610_v38 = vpack.c.bf16 %v1427_v37, %v1426_v36  ;;  %v2998_v36 = vld [vmem:[%s4770_s8 + $0x9] ss:$0 sm:$0xff] }
 0xd57   :  { %1272 = vadd.xlane.f32.xlu1 %v1271_v45  ;;  %v1268_v46 = vsel %vm159_vm1, %v4372_v44, 0.0  ;;  %v3614_v45 = vpack.c.bf16 %v1429_v40, %v1428_v39 }
 0xd58   :  { %1269 = vadd.xlane.f32.xlu0 %v1268_v46  ;;  %3611 = vmatprep.subr.bf16.mxu1 %v3610_v38  ;;  %v2989_v46 = vld [vmem:[%s4772_s10] ss:$0 sm:$0xff] }
 0xd59   :  { %3613 = vmatpush3.bf16.msra.mxu1 %v3610_v38 }
 0xd5a   :  { %3615 = vmatprep.subr.bf16.mxu1 %v3614_v45 }
 0xd5d   :  { %3617 = vmatpush3.bf16.msra.mxu1 %v3614_v45  ;;  %v3004_v45 = vld [vmem:[%s4768_s6 + $0x1] ss:$0 sm:$0xff] }
 0xde4   :  { %v1273_v47 = vpop.xlane.xlu1 %1272 }
 0xde5   :  { %v1275_v48 = vmul.f32 0.03125, %v1273_v47  ;;  %v1270_v49 = vpop.xlane.xlu0 %1269 }
 0xde6   :  { %v1274_v51 = vmul.f32 0.03125, %v1270_v49 }
 0xde7   :  { %v1277_v14 = vsub.f32 %v4370_v43, %v1275_v48 }
 0xde8   :  { %v1276_v10 = vsub.f32 %v4372_v44, %v1274_v51 }
 0xde9   :  { %v1279_v56 = vmul.f32 %v1277_v14, %v1277_v14 }
 0xdea   :  { %v1278_v54 = vmul.f32 %v1276_v10, %v1276_v10 }
 0xdeb   :  { %v1283_v57 = vsel %vm163_vm2, %v1279_v56, 0.0 }
 0xdec   :  { %v1280_v55 = vsel %vm159_vm1, %v1278_v54, 0.0 }
 0xded   :  { %1281 = vadd.xlane.f32.xlu0 %v1280_v55 }
 0xdf1   :  { %1284 = vadd.xlane.f32.xlu0 %v1283_v57 }
 0xe7a   :  { %v1282_v50 = vpop.xlane.xlu0 %1281 }
 0xe7b   :  { %v1286_v63 = vmul.f32 0.03125, %v1282_v50 }
 0xe7d   :  { %v1288_v0 = vadd.f32 1e-05, %v1286_v63  ;;  %v2994_v63 = vld [vmem:[%s4770_s8 + $0x5] ss:$0 sm:$0xff] }
 0xe7e   :  { %v1285_v42 = vpop.xlane.xlu0 %1284 }
 0xe7f   :  { %3867 = vrsqrt.f32 %v1288_v0  ;;  %v1287_v1 = vmul.f32 0.03125, %v1285_v42 }
 0xe81   :  { %v1289_v5 = vadd.f32 1e-05, %v1287_v1 }
 0xe83   :  { %3869 = vrsqrt.f32 %v1289_v5 }
 0xe89   :  { %v3868_v41 = vpop.eup %3867 }
 0xe8a   :  { %v1292_v8 = vmul.f32 %v3868_v41, %v1276_v10 }
 0xe8c   :  { %v1298_v11 = vmul.f32 %v2987_v7, %v1292_v8 }
 0xe8d   :  { %v3870_v13 = vpop.eup %3869 }
 0xe8e   :  { %v1293_v12 = vmul.f32 %v3870_v13, %v1277_v14  ;;  %v1304_v15 = vadd.f32 %v2988_v9, %v1298_v11 }
 0xe90   :  { %v1299_v16 = vmul.f32 %v2987_v7, %v1293_v12  ;;  %3305 = vmatprep.mubr.msk.f32.mxu0 %vm159_vm1, %v1304_v15 }
 0xe92   :  { %v1305_v17 = vadd.f32 %v2988_v9, %v1299_v16 }
 0xe94   :  { %3306 = vmatmul.mubr.msk.f32.vlgmr.msra.gmra.mrb[10].mxu0 %vm159_vm1, %v1305_v17 }
 0xe95   :  { %3621 = vmatpush3.bf16.msra.mxu0 %v3618_v21 }
 0xe96   :  { %3623 = vmatprep.subr.bf16.mxu0 %v3622_v23 }
 0xe99   :  { %3625 = vmatpush3.bf16.msra.mxu0 %v3622_v23 }
 0xf67   :  { %v3307_v47 = vpop.f32.mrb[10].mxu0 }
 0xf68   :  { %v1395_v48 = vadd.f32 %v3307_v47, %v2989_v46  ;;  %v1389_v49 = vpop.f32.mrb[11].mxu0 }
 0xf69   :  { %v1390_v51 = vadd.f32 %v2989_v46, %v1389_v49 }
 0xf6a   :  { %v2993_v14 = vmul.f32 -1.702, %v1395_v48 }
 0xf6b   :  { %v2992_v10 = vmul.f32 -1.702, %v1390_v51 }
 0xf6c   :  { %v1404_v54 = vmul.f32 1.442695, %v2993_v14 }
 0xf6d   :  { %v1402_v55 = vmul.f32 1.442695, %v2992_v10 }
 0xf6e   :  { %3871 = vpow2.f32 %v1404_v54 }
 0xf6f   :  { %3873 = vpow2.f32 %v1402_v55 }
 0xf78   :  { %v3872_v56 = vpop.eup %3871 }
 0xf79   :  { %v3874_v57 = vpop.eup %3873  ;;  %v1407_v58 = vadd.f32 1.0, %v3872_v56 }
 0xf7a   :  { %v1406_v59 = vadd.f32 1.0, %v3874_v57 }
 0xf7b   :  { %3875 = vrcp.f32 %v1407_v58 }
 0xf7c   :  { %3877 = vrcp.f32 %v1406_v59 }
 0xf85   :  { %v3876_v61 = vpop.eup %3875 }
 0xf86   :  { %v3878_v52 = vpop.eup %3877  ;;  %v1413_v53 = vmul.f32 %v3876_v61, %v1395_v48 }
 0xf87   :  { %v1412_v62 = vmul.f32 %v3878_v52, %v1390_v51 }
 0xf89   :  { %3340 = vmatprep.mubr.f32.mxu1 %v1412_v62 }
 0xf8a   :  { %3341 = vmatmul.mubr.f32.vlgmr.msra.gmra.mrb[14].mxu1 %v1413_v53 }
0x105d   :  { %v3342_v50 = vpop.f32.mrb[14].mxu1 }
0x105e   :  { %v1506_v0 = vadd.f32 %v3342_v50, %v4370_v43  ;;  %v1496_v42 = vpop.f32.mrb[15].mxu1 }
0x105f   :  { %v1505_v1 = vadd.f32 %v1496_v42, %v4372_v44 }
0x1060   :  { %v4458_v5 = vadd.f32 %v2994_v63, %v1506_v0 }
0x1061   :  { %v4460_v41 = vadd.f32 %v2994_v63, %v1505_v1 }
0x1062   :  { %v1520_v7 = vsel %vm163_vm2, %v4458_v5, 0.0 }
0x1063   :  { %1521 = vadd.xlane.f32.xlu1 %v1520_v7  ;;  %v1517_v8 = vsel %vm159_vm1, %v4460_v41, 0.0 }
0x1064   :  { %1518 = vadd.xlane.f32.xlu0 %v1517_v8 }
0x10f0   :  { %v1522_v9 = vpop.xlane.xlu1 %1521 }
0x10f1   :  { %v1524_v11 = vmul.f32 0.03125, %v1522_v9  ;;  %v1519_v13 = vpop.xlane.xlu0 %1518 }
0x10f2   :  { %v1523_v12 = vmul.f32 0.03125, %v1519_v13 }
0x10f3   :  { %v1526_v43 = vsub.f32 %v4458_v5, %v1524_v11 }
0x10f4   :  { %v1525_v44 = vsub.f32 %v4460_v41, %v1523_v12 }
0x10f5   :  { %v1528_v15 = vmul.f32 %v1526_v43, %v1526_v43 }
0x10f6   :  { %v1527_v16 = vmul.f32 %v1525_v44, %v1525_v44 }
0x10f7   :  { %v1532_v17 = vsel %vm163_vm2, %v1528_v15, 0.0 }
0x10f8   :  { %1533 = vadd.xlane.f32.xlu1 %v1532_v17  ;;  %v1529_v18 = vsel %vm159_vm1, %v1527_v16, 0.0 }
0x10f9   :  { %1530 = vadd.xlane.f32.xlu0 %v1529_v18 }
0x1185   :  { %v1534_v24 = vpop.xlane.xlu1 %1533 }
0x1186   :  { %v1536_v25 = vmul.f32 0.03125, %v1534_v24  ;;  %v1531_v26 = vpop.xlane.xlu0 %1530 }
0x1187   :  { %v1535_v27 = vmul.f32 0.03125, %v1531_v26 }
0x1188   :  { %v1538_v28 = vadd.f32 1e-05, %v1536_v25 }
0x1189   :  { %v1537_v29 = vadd.f32 1e-05, %v1535_v27 }
0x118a   :  { %3879 = vrsqrt.f32 %v1538_v28 }
0x118b   :  { %3881 = vrsqrt.f32 %v1537_v29 }
0x1194   :  { %v3880_v30 = vpop.eup %3879 }
0x1195   :  { %v3882_v33 = vpop.eup %3881  ;;  %v1542_v34 = vmul.f32 %v3880_v30, %v1526_v43 }
0x1196   :  { %v1541_v35 = vmul.f32 %v3882_v33, %v1525_v44 }
0x1197   :  { %v1548_v37 = vmul.f32 %v2997_v31, %v1542_v34 }
0x1198   :  { %v1547_v38 = vmul.f32 %v2997_v31, %v1541_v35 }
0x1199   :  { %v1554_v40 = vadd.f32 %v2998_v36, %v1548_v37 }
0x119a   :  { %v1553_v39 = vadd.f32 %v2998_v36, %v1547_v38 }
0x119c   :  { %3351 = vmatprep.mubr.msk.f32.mxu0 %vm159_vm1, %v1553_v39 }
0x119d   :  { %3352 = vmatmul.mubr.msk.f32.vlgmr.msra.gmra.mrb[12].mxu0 %vm159_vm1, %v1554_v40 }
0x1270   :  { %v3353_v46 = vpop.f32.mrb[12].mxu0 }
0x1271   :  { %v4493_v47 = vadd.f32 %v3353_v46, %v3004_v45  ;;  %v1640_v48 = vpop.f32.mrb[13].mxu0 }
0x1272   :  { %v4495_v49 = vadd.f32 %v3004_v45, %v1640_v48 }
0x1274   :  { %3358 = vmatprep.mubr.msk.f32.mxu0 %vm340_vm3, %v4495_v49  ;;  %v4501_v51 = vpack.i.bf16 %v4493_v47, %v4495_v49 }
0x1276   :  { %3788 = vrot.lane.b32.xlu0 %v4501_v51, %s3957_s15 }
0x127a   :  { %3798 = vrot.lane.b32.xlu0 %v4501_v51, %s3956_s14 }
0x127e   :  { %1848 = vrot.lane.b32.xlu0 %v4495_v49, %s3958_s0 }
0x1282   :  { %3803 = vrot.lane.b32.xlu0 %v4501_v51, %s3959_s19  ;;  %s4784_s19 = smov 16  }
0x1286   :  { %2049 = vrot.lane.b32.xlu0 %v4495_v49, %s3960_s20 }
0x12e8   :  { %v3789_v14 = vpop.permute.xlu0 %3788 }
0x12e9   :  { %v3791_v10 = vunpack.i.h.bf16 %v3789_v14  ;;  %v3790_v54 = vunpack.i.l.bf16 %v3789_v14 }
0x12eb   :  { %v3626_v55 = vpack.c.bf16 %v3791_v10, %v3790_v54 }
0x12ec   :  { %v3799_v56 = vpop.permute.xlu0 %3798 }
0x12ed   :  { %3628 = vmatprep.subr.msk.bf16.mxu0 %vm4213_vm4, %v3626_v55  ;;  %v3801_v43 = vunpack.i.h.bf16 %v3799_v56  ;;  %v3800_v15 = vunpack.i.l.bf16 %v3799_v56 }
0x12ee   :  { %3631 = vmatpush3.bf16.xpose.msk.msra.mxu0 %vm4213_vm4, %v3626_v55 }
0x12ef   :  { %v3638_v19 = vpack.c.bf16 %v3801_v43, %v3800_v15 }
0x12f0   :  { %v1849_v57 = vpop.permute.xlu0 %1848 }
0x12f4   :  { %v3804_v58 = vpop.permute.xlu0 %3803 }
0x12f5   :  { %v3806_v59 = vunpack.i.h.bf16 %v3804_v58  ;;  %v3805_v61 = vunpack.i.l.bf16 %v3804_v58  ;;  %3359 = vmatmul.mubr.msk.f32.vlgmr.msra.gmra.mrb[14].mxu0 %vm340_vm3, %v4493_v47 }
0x12f7   :  { %v3650_v52 = vpack.c.bf16 %v3806_v59, %v3805_v61 }
0x12f8   :  { %v2050_v62 = vpop.permute.xlu0 %2049 }
0x12f9   :  { %3652 = vmatprep.subr.msk.bf16.mxu1 %vm4213_vm4, %v3650_v52  ;;  %3386 = vmatprep.mubr.msk.f32.mxu1 %vm340_vm3, %v2050_v62 }
0x12fa   :  { %3655 = vmatpush3.bf16.xpose.msk.msra.mxu1 %vm4213_vm4, %v3650_v52 }
0x13c8   :  { %v3360_v53 = vpop.f32.mrb[14].mxu0 }
0x13c9   :  { %v1729_v50 = vpop.f32.mrb[15].mxu0  ;;  %v1735_v0 = vadd.f32 %v3360_v53, %v4236_v4 }
0x13ca   :  { %v1730_v63 = vadd.f32 %v1729_v50, %v4241_v6 }
0x13cb   :  { %v1741_v1 = vsel %vm428_vm5, %v1735_v0, -inf }
0x13cc   :  { %v1738_v42 = vsel %vm424_vm6, %v1730_v63, -inf }
0x13cd   :  { %1739 = vmax.xlane.f32.xlu1 %v1738_v42 }
0x13d1   :  { %1742 = vmax.xlane.f32.xlu1 %v1741_v1 }
0x13e2   :  { %3793 = vrot.lane.b32.xlu1 %v4501_v51, %s3967_s26 }
0x145a   :  { %v1740_v7 = vpop.xlane.xlu1 %1739 }
0x145b   :  { %v1744_v8 = vsub.f32 %v1730_v63, %v1740_v7 }
0x145d   :  { %v1746_v13 = vmul.f32 1.442695, %v1744_v8 }
0x145e   :  { %v1743_v9 = vpop.xlane.xlu1 %1742 }
0x145f   :  { %v1745_v11 = vsub.f32 %v1735_v0, %v1743_v9 }
0x1461   :  { %v1748_v12 = vmul.f32 1.442695, %v1745_v11 }
0x1462   :  { %v3794_v44 = vpop.permute.xlu1 %3793 }
0x1463   :  { %3883 = vpow2.f32 %v1748_v12  ;;  %v3796_v16 = vunpack.i.h.bf16 %v3794_v44  ;;  %v3795_v17 = vunpack.i.l.bf16 %v3794_v44 }
0x1464   :  { %3885 = vpow2.f32 %v1746_v13 }
0x1465   :  { %v3632_v18 = vpack.c.bf16 %v3796_v16, %v3795_v17 }
0x1467   :  { %3634 = vmatprep.subr.msk.bf16.mxu0 %vm4257_vm9, %v3632_v18 }
0x1468   :  { %3637 = vmatpush3.bf16.msk.msra.mxu0 %vm4257_vm9, %v3632_v18 }
0x1469   :  { %3640 = vmatprep.subr.msk.bf16.mxu0 %vm4213_vm4, %v3638_v19 }
0x146d   :  { %v3884_v20 = vpop.eup %3883 }
0x146e   :  { %v1753_v21 = vsel %vm428_vm5, %v3884_v20, 0.0  ;;  %v3886_v22 = vpop.eup %3885 }
0x146f   :  { %1754 = vadd.xlane.f32.xlu1 %v1753_v21  ;;  %v1750_v2 = vsel %vm424_vm6, %v3886_v22, 0.0 }
0x1473   :  { %1751 = vadd.xlane.f32.xlu1 %v1750_v2 }
0x1484   :  { %1850 = vrot.lane.b32.xlu1 %v4493_v47, %s3958_s0 }
0x1488   :  { %2051 = vrot.lane.b32.xlu1 %v4493_v47, %s3960_s20 }
0x14fc   :  { %v1755_v23 = vpop.xlane.xlu1 %1754 }
0x14fd   :  { %3887 = vrcp.f32 %v1755_v23 }
0x1500   :  { %v1752_v24 = vpop.xlane.xlu1 %1751 }
0x1501   :  { %3889 = vrcp.f32 %v1752_v24 }
0x1504   :  { %v1851_v25 = vpop.permute.xlu1 %1850 }
0x1507   :  { %v3888_v27 = vpop.eup %3887 }
0x1508   :  { %v2052_v26 = vpop.permute.xlu1 %2051  ;;  %v1759_v30 = vmul.f32 %v3888_v27, %v3884_v20 }
0x1509   :  { %3387 = vmatmul.mubr.msk.f32.vlgmr.msra.gmra.mrb[16].mxu1 %vm340_vm3, %v2052_v26 }
0x150b   :  { %v3890_v28 = vpop.eup %3889 }
0x150c   :  { %v1758_v29 = vmul.f32 %v3890_v28, %v3886_v22 }
0x150e   :  { %3365 = vmatprep.mubr.msk.f32.mxu0 %vm424_vm6, %v1758_v29 }
0x150f   :  { %3366 = vmatmul.mubr.msk.f32.vlgmr.msra.gmra.mrb[16].mxu0 %vm424_vm6, %v1759_v30 }
0x1510   :  { %3643 = vmatpush3.bf16.xpose.msk.msra.mxu0 %vm4213_vm4, %v3638_v19  ;;  %3372 = vmatprep.mubr.msk.f32.mxu0 %vm340_vm3, %v1849_v57 }
0x1517   :  { %3373 = vmatmul.mubr.msk.f32.vlgmr.msra.gmra.mrb[18].mxu0 %vm340_vm3, %v1851_v25 }
0x15dc   :  { %v3388_v31 = vpop.f32.mrb[16].mxu1 }
0x15dd   :  { %v2131_v33 = vpop.f32.mrb[17].mxu1  ;;  %v2137_v48 = vadd.f32 %v3388_v31, %v4236_v4 }
0x15de   :  { %v2132_v45 = vadd.f32 %v2131_v33, %v4241_v6 }
0x15df   :  { %v2143_v10 = vsel %vm428_vm5, %v2137_v48, -inf }
0x15e0   :  { %v2140_v14 = vsel %vm424_vm6, %v2132_v45, -inf }
0x15e2   :  { %v4549_v34 = vpop.f32.mrb[16].mxu0 }
0x15e3   :  { %v4551_v35 = vpop.f32.mrb[17].mxu0 }
0x15ea   :  { %v3374_v36 = vpop.f32.mrb[18].mxu0 }
0x15eb   :  { %v1936_v37 = vadd.f32 %v3374_v36, %v4236_v4  ;;  %v1930_v38 = vpop.f32.mrb[19].mxu0 }
0x15ec   :  { %v1931_v39 = vadd.f32 %v1930_v38, %v4241_v6 }
0x15ed   :  { %v1942_v40 = vsel %vm428_vm5, %v1936_v37, -inf }
0x15ee   :  { %1943 = vmax.xlane.f32.xlu1 %v1942_v40  ;;  %v1939_v46 = vsel %vm424_vm6, %v1931_v39, -inf }
0x15ef   :  { %1940 = vmax.xlane.f32.xlu0 %v1939_v46 }
0x15f3   :  { %2141 = vmax.xlane.f32.xlu0 %v2140_v14  ;;  %v3930_v14 = vld [vmem:[%s4766_s4] sm:$0xff] }
0x15f7   :  { %2144 = vmax.xlane.f32.xlu0 %v2143_v10 }
0x167b   :  { %v1944_v56 = vpop.xlane.xlu1 %1943 }
0x167c   :  { %v1941_v54 = vpop.xlane.xlu0 %1940  ;;  %v1946_v59 = vsub.f32 %v1936_v37, %v1944_v56 }
0x167d   :  { %v1945_v55 = vsub.f32 %v1931_v39, %v1941_v54 }
0x167e   :  { %v1949_v53 = vmul.f32 1.442695, %v1946_v59 }
0x167f   :  { %v1947_v61 = vmul.f32 1.442695, %v1945_v55 }
0x1680   :  { %v2142_v57 = vpop.xlane.xlu0 %2141 }
0x1681   :  { %v2146_v58 = vsub.f32 %v2132_v45, %v2142_v57  ;;  %v3929_v45 = vld [vmem:[%s4766_s4 + $0x8] sm:$0x3] }
0x1683   :  { %v2148_v6 = vmul.f32 1.442695, %v2146_v58 }
0x1684   :  { %v2145_v52 = vpop.xlane.xlu0 %2144 }
0x1685   :  { %3891 = vpow2.f32 %v2148_v6  ;;  %v2147_v62 = vsub.f32 %v2137_v48, %v2145_v52 }
0x1686   :  { %3893 = vpow2.f32 %v1947_v61 }
0x1687   :  { %v2150_v4 = vmul.f32 1.442695, %v2147_v62 }
0x1689   :  { %3895 = vpow2.f32 %v2150_v4 }
0x168a   :  { %3897 = vpow2.f32 %v1949_v53 }
0x168f   :  { %v3892_v50 = vpop.eup %3891 }
0x1690   :  { %v2152_v63 = vsel %vm424_vm6, %v3892_v50, 0.0  ;;  %v3894_v0 = vpop.eup %3893 }
0x1691   :  { %2153 = vadd.xlane.f32.xlu0 %v2152_v63  ;;  %v1951_v1 = vsel %vm424_vm6, %v3894_v0, 0.0 }
0x1693   :  { %v3896_v42 = vpop.eup %3895 }
0x1694   :  { %v2155_v7 = vsel %vm428_vm5, %v3896_v42, 0.0  ;;  %v3898_v8 = vpop.eup %3897 }
0x1695   :  { %1952 = vadd.xlane.f32.xlu0 %v1951_v1  ;;  %2156 = vadd.xlane.f32.xlu1 %v2155_v7  ;;  %v1954_v9 = vsel %vm428_vm5, %v3898_v8, 0.0 }
0x1699   :  { %1955 = vadd.xlane.f32.xlu1 %v1954_v9  ;;  %v3035_v9 = vld [vmem:[%s4769_s7 + $0x20] sm:$0xff] }
0x16aa   :  { %3813 = vrot.lane.b32.xlu1 %v4501_v51, %s3965_s24 }
0x16ab   :  { %3808 = vrot.lane.b32.xlu0 %v4501_v51, %s3961_s21 }
0x16ae   :  { %3818 = vrot.lane.b32.xlu1 %v4501_v51, %s3963_s22 }
0x16af   :  { %2252 = vrot.lane.b32.xlu0 %v4493_v47, %s3964_s23 }
0x16b2   :  { %2250 = vrot.lane.b32.xlu1 %v4495_v49, %s3964_s23 }
0x171e   :  { %v2154_v11 = vpop.xlane.xlu0 %2153 }
0x1722   :  { %v2157_v13 = vpop.xlane.xlu1 %2156  ;;  %v1953_v12 = vpop.xlane.xlu0 %1952 }
0x1723   :  { %3899 = vrcp.f32 %v1953_v12 }
0x1724   :  { %3901 = vrcp.f32 %v2154_v11  ;;  %v3036_v11 = vld [vmem:[%s4769_s7 + $0x28] sm:$0xff] }
0x1725   :  { %v3674_v12 = vpack.c.bf16 %v3036_v11, %v3035_v9  ;;  %v3059_v11 = vld [vmem:[%s4773_s11 + $0x90] sm:$0xff] }
0x1726   :  { %v1956_v43 = vpop.xlane.xlu1 %1955  ;;  %v3809_v44 = vpop.permute.xlu0 %3808 }
0x1727   :  { %3903 = vrcp.f32 %v1956_v43  ;;  %v3811_v15 = vunpack.i.h.bf16 %v3809_v44  ;;  %v3810_v16 = vunpack.i.l.bf16 %v3809_v44  ;;  %v3038_v43 = vld [vmem:[%s4769_s7 + $0x38] sm:$0xff] }
0x1728   :  { %3905 = vrcp.f32 %v2157_v13  ;;  %v3037_v13 = vld [vmem:[%s4769_s7 + $0x30] sm:$0xff] }
0x1729   :  { %v3644_v17 = vpack.c.bf16 %v3811_v15, %v3810_v16  ;;  %v3678_v44 = vpack.c.bf16 %v3038_v43, %v3037_v13  ;;  %v3060_v13 = vld [vmem:[%s4773_s11 + $0x98] sm:$0xff]  ;;  %v3061_v43 = vld [vmem:[%s4773_s11 + $0xa0] sm:$0xff] }
0x172a   :  { %v3814_v18 = vpop.permute.xlu1 %3813  ;;  %v2253_v33 = vpop.permute.xlu0 %2252 }
0x172b   :  { %v3816_v19 = vunpack.i.h.bf16 %v3814_v18  ;;  %v3815_v20 = vunpack.i.l.bf16 %v3814_v18  ;;  %3646 = vmatprep.subr.msk.bf16.mxu0 %vm4257_vm9, %v3644_v17 }
0x172c   :  { %3649 = vmatpush3.bf16.msk.msra.mxu0 %vm4257_vm9, %v3644_v17 }
0x172d   :  { %v3656_v47 = vpack.c.bf16 %v3816_v19, %v3815_v20  ;;  %v3900_v49 = vpop.eup %3899 }
0x172e   :  { %v3819_v21 = vpop.permute.xlu1 %3818  ;;  %v1959_v22 = vmul.f32 %v3900_v49, %v3894_v0  ;;  %v3902_v2 = vpop.eup %3901 }
0x172f   :  { %3658 = vmatprep.subr.msk.bf16.mxu0 %vm4257_vm9, %v3656_v47  ;;  %v3821_v23 = vunpack.i.h.bf16 %v3819_v21  ;;  %v3820_v24 = vunpack.i.l.bf16 %v3819_v21  ;;  %v2160_v28 = vmul.f32 %v3902_v2, %v3892_v50 }
0x1730   :  { %3379 = vmatprep.mubr.msk.f32.mxu0 %vm424_vm6, %v1959_v22 }
0x1731   :  { %v3904_v25 = vpop.eup %3903  ;;  %v3662_v29 = vpack.c.bf16 %v3821_v23, %v3820_v24 }
0x1732   :  { %v1960_v26 = vmul.f32 %v3904_v25, %v3898_v8  ;;  %v3906_v27 = vpop.eup %3905  ;;  %v2251_v31 = vpop.permute.xlu1 %2250 }
0x1733   :  { %v2161_v30 = vmul.f32 %v3906_v27, %v3896_v42 }
0x1734   :  { %3380 = vmatmul.mubr.msk.f32.vlgmr.msra.gmra.mrb[20].mxu0 %vm424_vm6, %v1960_v26 }
0x1735   :  { %3661 = vmatpush3.bf16.msk.msra.mxu0 %vm4257_vm9, %v3656_v47  ;;  %3393 = vmatprep.mubr.msk.f32.mxu0 %vm424_vm6, %v2160_v28 }
0x1736   :  { %3664 = vmatprep.subr.msk.bf16.mxu0 %vm4213_vm4, %v3662_v29 }
0x1738   :  { %3394 = vmatmul.mubr.msk.f32.vlgmr.msra.gmra.mrb[22].mxu0 %vm424_vm6, %v2161_v30 }
0x1739   :  { %3400 = vmatprep.mubr.msk.f32.mxu0 %vm340_vm3, %v2251_v31 }
0x173e   :  { %3667 = vmatpush3.bf16.xpose.msk.msra.mxu0 %vm4213_vm4, %v3662_v29 }
0x1745   :  { %3401 = vmatmul.mubr.msk.f32.vlgmr.msra.gmra.mrb[24].mxu0 %vm340_vm3, %v2253_v33 }
0x1807   :  { %v3381_v36 = vpop.f32.mrb[20].mxu0 }
0x1808   :  { %v2040_v37 = vpop.f32.mrb[21].mxu0 }
0x180b   :  { %v3395_v38 = vpop.f32.mrb[22].mxu0 }
0x180c   :  { %v2241_v39 = vpop.f32.mrb[23].mxu0 }
0x1818   :  { %v3402_v40 = vpop.f32.mrb[24].mxu0 }
0x1819   :  { %v2338_v46 = vadd.f32 %v3929_v45, %v3402_v40  ;;  %v2332_v48 = vpop.f32.mrb[25].mxu0 }
0x181a   :  { %v2333_v60 = vadd.f32 %v3930_v14, %v2332_v48  ;;  %v3047_v14 = vld [vmem:[%s4771_s9 + $0x20] sm:$0xff] }
0x181b   :  { %v2344_v10 = vsel %vm428_vm5, %v2338_v46, -inf }
0x181c   :  { %2345 = vmax.xlane.f32.xlu0 %v2344_v10  ;;  %v2341_v54 = vsel %vm424_vm6, %v2333_v60, -inf }
0x181d   :  { %2342 = vmax.xlane.f32.xlu1 %v2341_v54  ;;  %v3049_v54 = vld [vmem:[%s4771_s9 + $0x30] sm:$0xff] }
0x182e   :  { %3823 = vrot.lane.b32.xlu1 %v4501_v51, %s3966_s25 }
0x1832   :  { %2455 = vrot.lane.b32.xlu1 %v3381_v36, %s3968_s27 }
0x1836   :  { %2461 = vrot.lane.b32.xlu1 %v2241_v39, %s4784_s19 }
0x183a   :  { %2463 = vrot.lane.b32.xlu1 %v3395_v38, %s4784_s19 }
0x18a9   :  { %v2346_v55 = vpop.xlane.xlu0 %2345 }
0x18aa   :  { %v2348_v56 = vsub.f32 %v2338_v46, %v2346_v55  ;;  %v2343_v57 = vpop.xlane.xlu1 %2342  ;;  %v3050_v55 = vld [vmem:[%s4771_s9 + $0x38] sm:$0xff] }
0x18ab   :  { %v2347_v58 = vsub.f32 %v2333_v60, %v2343_v57  ;;  %v3048_v60 = vld [vmem:[%s4771_s9 + $0x28] sm:$0xff] }
0x18ac   :  { %v2351_v59 = vmul.f32 1.442695, %v2348_v56  ;;  %v3682_v10 = vpack.c.bf16 %v3048_v60, %v3047_v14  ;;  %v3686_v56 = vpack.c.bf16 %v3050_v55, %v3049_v54  ;;  %v3074_v54 = vld [vmem:[%s4770_s8 + $0xd] ss:$0 sm:$0xff] }
0x18ad   :  { %v2349_v61 = vmul.f32 1.442695, %v2347_v58 }
0x18ae   :  { %v3824_v6 = vpop.permute.xlu1 %3823  ;;  %3683 = vmatprep.subr.bf16.mxu0 %v3682_v10 }
0x18af   :  { %3907 = vpow2.f32 %v2349_v61  ;;  %v3826_v52 = vunpack.i.h.bf16 %v3824_v6  ;;  %v3825_v62 = vunpack.i.l.bf16 %v3824_v6  ;;  %3685 = vmatpush3.bf16.msra.mxu0 %v3682_v10 }
0x18b0   :  { %3909 = vpow2.f32 %v2351_v59  ;;  %3687 = vmatprep.subr.bf16.mxu0 %v3686_v56 }
0x18b1   :  { %v3668_v53 = vpack.c.bf16 %v3826_v52, %v3825_v62 }
0x18b2   :  { %v2456_v17 = vpop.permute.xlu1 %2455 }
0x18b3   :  { %3670 = vmatprep.subr.msk.bf16.mxu1 %vm4257_vm9, %v3668_v53  ;;  %v2476_v21 = vsel %vm340_vm3, %v4549_v34, %v2456_v17  ;;  %3689 = vmatpush3.bf16.msra.mxu0 %v3686_v56  ;;  %v3064_v17 = vld [vmem:[%s4773_s11 + $0xb8] sm:$0xff] }
0x18b4   :  { %3673 = vmatpush3.bf16.msk.msra.mxu1 %vm4257_vm9, %v3668_v53  ;;  %3722 = vmatprep.subr.bf16.mxu0 %v3955_v3  ;;  %v3045_v53 = vld [vmem:[%s4770_s8 + $0xb] ss:$0 sm:$0xff] }
0x18b5   :  { %3675 = vmatprep.subr.bf16.mxu1 %v3674_v12 }
0x18b6   :  { %v2462_v18 = vpop.permute.xlu1 %2461 }
0x18b9   :  { %v3908_v51 = vpop.eup %3907 }
0x18ba   :  { %v2353_v4 = vsel %vm424_vm6, %v3908_v51, 0.0  ;;  %v3910_v50 = vpop.eup %3909  ;;  %v2464_v20 = vpop.permute.xlu1 %2463 }
0x18bb   :  { %2354 = vadd.xlane.f32.xlu0 %v2353_v4  ;;  %v2356_v63 = vsel %vm428_vm5, %v3910_v50, 0.0  ;;  %v2478_v23 = vsel %vm1166_vm10, %v2476_v21, %v2464_v20  ;;  %v3046_v4 = vld [vmem:[%s4770_s8 + $0xc] ss:$0 sm:$0xff]  ;;  %v3068_v21 = vld [vmem:[%s4773_s11 + $0xd8] sm:$0xff] }
0x18bc   :  { %v3066_v20 = vld [vmem:[%s4773_s11 + $0xc8] sm:$0xff] }
0x18bf   :  { %2357 = vadd.xlane.f32.xlu0 %v2356_v63 }
0x18d5   :  { %2453 = vrot.lane.b32.xlu0 %v2040_v37, %s3968_s27  ;;  %s4785_s27 = smov 24  }
0x1948   :  { %v2355_v0 = vpop.xlane.xlu0 %2354 }
0x1949   :  { %3911 = vrcp.f32 %v2355_v0 }
0x194c   :  { %v2358_v42 = vpop.xlane.xlu0 %2357 }
0x194d   :  { %3913 = vrcp.f32 %v2358_v42 }
0x1950   :  { %v2454_v19 = vpop.permute.xlu0 %2453 }
0x1951   :  { %v2475_v47 = vsel %vm340_vm3, %v4551_v35, %v2454_v19  ;;  %v3042_v35 = vld [vmem:[%s4770_s8 + $0xa] ss:$0 sm:$0xff]  ;;  %v3065_v19 = vld [vmem:[%s4773_s11 + $0xc0] sm:$0xff] }
0x1952   :  { %v2477_v22 = vsel %vm1166_vm10, %v2475_v47, %v2462_v18  ;;  %v3706_v47 = vpack.c.bf16 %v3066_v20, %v3065_v19 }
0x1953   :  { %v3912_v1 = vpop.eup %3911 }
0x1954   :  { %v2361_v7 = vmul.f32 %v3912_v1, %v3908_v51 }
0x1956   :  { %3407 = vmatprep.mubr.msk.f32.mxu1 %vm424_vm6, %v2361_v7 }
0x1957   :  { %v3914_v32 = vpop.eup %3913 }
0x1958   :  { %v2362_v8 = vmul.f32 %v3914_v32, %v3910_v50  ;;  %v3057_v32 = vld [vmem:[%s4773_s11 + $0x80] sm:$0xff] }
0x195a   :  { %3408 = vmatmul.mubr.msk.f32.vlgmr.msra.gmra.mrb[18].mxu1 %vm424_vm6, %v2362_v8  ;;  %v3058_v8 = vld [vmem:[%s4773_s11 + $0x88] sm:$0xff] }
0x195b   :  { %3677 = vmatpush3.bf16.msra.mxu1 %v3674_v12  ;;  %v3690_v9 = vpack.c.bf16 %v3058_v8, %v3057_v32  ;;  %v3694_v12 = vpack.c.bf16 %v3060_v13, %v3059_v11  ;;  %v3076_v11 = vld [vmem:[%s4765_s3 + $0x3] ss:$0 sm:$0xff] }
0x195c   :  { %3679 = vmatprep.subr.bf16.mxu1 %v3678_v44 }
0x195f   :  { %3681 = vmatpush3.bf16.msra.mxu1 %v3678_v44  ;;  %v3062_v44 = vld [vmem:[%s4773_s11 + $0xa8] sm:$0xff] }
0x1960   :  { %3691 = vmatprep.subr.bf16.mxu1 %v3690_v9 }
0x1a2d   :  { %v3409_v15 = vpop.f32.mrb[18].mxu1 }
0x1a2e   :  { %2471 = vrot.lane.b32.xlu1 %v3409_v15, %s4785_s27  ;;  %v2442_v16 = vpop.f32.mrb[19].mxu1  ;;  %v3698_v15 = vpack.c.bf16 %v3062_v44, %v3061_v43 }
0x1a2f   :  { %2469 = vrot.lane.b32.xlu0 %v2442_v16, %s4785_s27  ;;  %v3063_v16 = vld [vmem:[%s4773_s11 + $0xb0] sm:$0xff] }
0x1a30   :  { %v3702_v18 = vpack.c.bf16 %v3064_v17, %v3063_v16 }
0x1aa0   :  { %v2472_v49 = vpop.permute.xlu1 %2471 }
0x1aa1   :  { %v2470_v2 = vpop.permute.xlu0 %2469  ;;  %v2480_v25 = vsel %vm1169_vm11, %v2478_v23, %v2472_v49  ;;  %v3067_v49 = vld [vmem:[%s4773_s11 + $0xd0] sm:$0xff]  ;;  %v3070_v23 = vld [vmem:[%s4773_s11 + $0xe8] sm:$0xff] }
0x1aa2   :  { %v2479_v24 = vsel %vm1169_vm11, %v2477_v22, %v2470_v2  ;;  %v3710_v22 = vpack.c.bf16 %v3068_v21, %v3067_v49  ;;  %v3069_v2 = vld [vmem:[%s4773_s11 + $0xe0] sm:$0xff] }
0x1aa3   :  { %3418 = vmatprep.mubr.msk.f32.mxu1 %vm159_vm1, %v2479_v24  ;;  %v3714_v24 = vpack.c.bf16 %v3070_v23, %v3069_v2 }
0x1aa4   :  { %3419 = vmatmul.mubr.msk.f32.vlgmr.msra.gmra.mrb[20].mxu1 %vm159_vm1, %v2480_v25  ;;  %v3071_v25 = vld [vmem:[%s4773_s11 + $0xf0] sm:$0xff] }
0x1aa5   :  { %3693 = vmatpush3.bf16.msra.mxu1 %v3690_v9 }
0x1aa6   :  { %3695 = vmatprep.subr.bf16.mxu1 %v3694_v12 }
0x1aa9   :  { %3697 = vmatpush3.bf16.msra.mxu1 %v3694_v12 }
0x1aaa   :  { %3699 = vmatprep.subr.bf16.mxu1 %v3698_v15 }
0x1aad   :  { %3701 = vmatpush3.bf16.msra.mxu1 %v3698_v15 }
0x1aae   :  { %3703 = vmatprep.subr.bf16.mxu1 %v3702_v18 }
0x1ab1   :  { %3705 = vmatpush3.bf16.msra.mxu1 %v3702_v18 }
0x1ab2   :  { %3707 = vmatprep.subr.bf16.mxu1 %v3706_v47 }
0x1ab5   :  { %3709 = vmatpush3.bf16.msra.mxu1 %v3706_v47 }
0x1ab6   :  { %3711 = vmatprep.subr.bf16.mxu1 %v3710_v22 }
0x1ab9   :  { %3713 = vmatpush3.bf16.msra.mxu1 %v3710_v22 }
0x1aba   :  { %3715 = vmatprep.subr.bf16.mxu1 %v3714_v24 }
0x1abd   :  { %3717 = vmatpush3.bf16.msra.mxu1 %v3714_v24 }
0x1b77   :  { %v3420_v26 = vpop.f32.mrb[20].mxu1 }
0x1b78   :  { %v2568_v34 = vadd.f32 %v3420_v26, %v4458_v5  ;;  %v2558_v27 = vpop.f32.mrb[21].mxu1  ;;  %v3072_v26 = vld [vmem:[%s4773_s11 + $0xf8] sm:$0xff] }
0x1b79   :  { %v2567_v28 = vadd.f32 %v2558_v27, %v4460_v41 }
0x1b7a   :  { %v2575_v29 = vadd.f32 %v3042_v35, %v2568_v34  ;;  %v3052_v34 = vld [vmem:[%s4772_s10 + $0x1] ss:$0 sm:$0xff] }
0x1b7b   :  { %v4644_v30 = vadd.f32 %v3042_v35, %v2567_v28  ;;  %v3718_v35 = vpack.c.bf16 %v3072_v26, %v3071_v25 }
0x1b7c   :  { %v2581_v31 = vsel %vm163_vm2, %v2575_v29, 0.0 }
0x1b7d   :  { %2582 = vadd.xlane.f32.xlu1 %v2581_v31  ;;  %v2578_v33 = vsel %vm159_vm1, %v4644_v30, 0.0  ;;  %3719 = vmatprep.subr.bf16.mxu1 %v3718_v35 }
0x1b7e   :  { %2579 = vadd.xlane.f32.xlu0 %v2578_v33  ;;  %3721 = vmatpush3.bf16.msra.mxu1 %v3718_v35 }
0x1c0a   :  { %v2583_v36 = vpop.xlane.xlu1 %2582 }
0x1c0b   :  { %v2585_v37 = vmul.f32 0.03125, %v2583_v36  ;;  %v2580_v38 = vpop.xlane.xlu0 %2579 }
0x1c0c   :  { %v2584_v39 = vmul.f32 0.03125, %v2580_v38 }
0x1c0d   :  { %v2587_v40 = vsub.f32 %v2575_v29, %v2585_v37 }
0x1c0e   :  { %v2586_v5 = vsub.f32 %v4644_v30, %v2584_v39 }
0x1c0f   :  { %v2589_v46 = vmul.f32 %v2587_v40, %v2587_v40 }
0x1c10   :  { %v2588_v45 = vmul.f32 %v2586_v5, %v2586_v5 }
0x1c11   :  { %v2593_v48 = vsel %vm163_vm2, %v2589_v46, 0.0 }
0x1c12   :  { %v2590_v41 = vsel %vm159_vm1, %v2588_v45, 0.0 }
0x1c13   :  { %2591 = vadd.xlane.f32.xlu0 %v2590_v41 }
0x1c17   :  { %2594 = vadd.xlane.f32.xlu0 %v2593_v48 }
0x1ca0   :  { %v2592_v57 = vpop.xlane.xlu0 %2591 }
0x1ca1   :  { %v2596_v58 = vmul.f32 0.03125, %v2592_v57 }
0x1ca3   :  { %v2598_v59 = vadd.f32 1e-05, %v2596_v58 }
0x1ca4   :  { %v2595_v61 = vpop.xlane.xlu0 %2594 }
0x1ca5   :  { %3915 = vrsqrt.f32 %v2598_v59  ;;  %v2597_v6 = vmul.f32 0.03125, %v2595_v61 }
0x1ca7   :  { %v2599_v52 = vadd.f32 1e-05, %v2597_v6 }
0x1ca9   :  { %3917 = vrsqrt.f32 %v2599_v52 }
0x1caf   :  { %v3916_v62 = vpop.eup %3915 }
0x1cb0   :  { %v2602_v51 = vmul.f32 %v3916_v62, %v2586_v5 }
0x1cb2   :  { %v2608_v50 = vmul.f32 %v3045_v53, %v2602_v51  ;;  %v2854_v51 = vld [vmem:[%s4774_s12] sm:$0xff] }
0x1cb3   :  { %v3918_v63 = vpop.eup %3917 }
0x1cb4   :  { %v2603_v0 = vmul.f32 %v3918_v63, %v2587_v40  ;;  %v2614_v42 = vadd.f32 %v3046_v4, %v2608_v50  ;;  %v2856_v50 = vld [vmem:[%s4774_s12 + $0x10] sm:$0xff]  ;;  %v2857_v63 = vld [vmem:[%s4774_s12 + $0x18] sm:$0xff] }
0x1cb6   :  { %v2609_v1 = vmul.f32 %v3045_v53, %v2603_v0  ;;  %3429 = vmatprep.mubr.msk.f32.mxu0 %vm159_vm1, %v2614_v42  ;;  %v3726_v0 = vpack.c.bf16 %v2857_v63, %v2856_v50  ;;  %v3972_v42 = vmov 0.0  }
0x1cb8   :  { %v2615_v7 = vadd.f32 %v3046_v4, %v2609_v1 }
0x1cba   :  { %3430 = vmatmul.mubr.msk.f32.vlgmr.msra.gmra.mrb[26].mxu0 %vm159_vm1, %v2615_v7 }
0x1cbb   :  { %3475 = vmatprep.mubr.msk.f32.mxu0 %vm3971_vm13, %v3972_v42 }
0x1d8d   :  { %v3431_v27 = vpop.f32.mrb[26].mxu0 }
0x1d8e   :  { %v2707_v28 = vadd.f32 %v3431_v27, %v3052_v34  ;;  %v2701_v29 = vpop.f32.mrb[27].mxu0 }
0x1d8f   :  { %v2702_v31 = vadd.f32 %v3052_v34, %v2701_v29 }
0x1d90   :  { %v3056_v33 = vmul.f32 -1.702, %v2707_v28 }
0x1d91   :  { %v3055_v36 = vmul.f32 -1.702, %v2702_v31 }
0x1d92   :  { %v2716_v37 = vmul.f32 1.442695, %v3056_v33 }
0x1d93   :  { %v2714_v38 = vmul.f32 1.442695, %v3055_v36 }
0x1d94   :  { %3919 = vpow2.f32 %v2716_v37 }
0x1d95   :  { %3921 = vpow2.f32 %v2714_v38 }
0x1d9e   :  { %v3920_v39 = vpop.eup %3919 }
0x1d9f   :  { %v3922_v40 = vpop.eup %3921  ;;  %v2719_v5 = vadd.f32 1.0, %v3920_v39 }
0x1da0   :  { %v2718_v45 = vadd.f32 1.0, %v3922_v40 }
0x1da1   :  { %3923 = vrcp.f32 %v2719_v5 }
0x1da2   :  { %3925 = vrcp.f32 %v2718_v45 }
0x1dab   :  { %v3924_v41 = vpop.eup %3923 }
0x1dac   :  { %v3926_v46 = vpop.eup %3925  ;;  %v2725_v14 = vmul.f32 %v3924_v41, %v2707_v28 }
0x1dad   :  { %v2724_v48 = vmul.f32 %v3926_v46, %v2702_v31 }
0x1daf   :  { %3464 = vmatprep.mubr.f32.mxu1 %v2724_v48 }
0x1db0   :  { %3465 = vmatmul.mubr.f32.vlgmr.msra.gmra.mrb[22].mxu1 %v2725_v14 }
0x1e83   :  { %v3466_v60 = vpop.f32.mrb[22].mxu1 }
0x1e84   :  { %v2809_v10 = vpop.f32.mrb[23].mxu1 }
0x1e85   :  { %v2817_v55 = vadd.f32 %v2809_v10, %v4644_v30  ;;  %v2855_v30 = vld [vmem:[%s4774_s12 + $0x8] sm:$0xff]  ;;  %s3973_s12 = smov [#allocation2]  }
0x1e86   :  { %v3723_v4 = vpack.c.bf16 %v2855_v30, %v2854_v51  ;;  %s2939_s17 = sshll.u32 %s3973_s12, 4  ;;  %s2940_s17 = int_to_ptr.vmem [resolvable:$true] %s2939_s17 }
0x1e87   :  { %v2823_v56 = vadd.f32 %v3074_v54, %v2817_v55  ;;  %s3931_s6 = scalar_lea.vmem %s2940_s17, 32  ;;  %p3936_p1 = scmp.lt.s32.totalorder %s2940_s17, %s2940_s17 }
0x1e88   :  { %3724 = vmatpush3.bf16.msra.mxu0 %v3723_v4  ;;  %p3932_p0 = scmp.ne.s32.totalorder %s2940_s17, %s3931_s6  ;;  %p3937_p2 = scmp.lt.s32.totalorder %s3931_s6, %s3931_s6 }
0x1e89   :  { %v2825_v57 = vrot.slane %v2823_v56, 4  ;;  %3725 = vmatprep.subr.bf16.mxu0 %v3955_v3  ;;  %v3075_v3 = vld [vmem:[%s4765_s3 + $0x2] ss:$0 sm:$0xff] }
0x1e8a   :  { %p3938_p3 = por %p3937_p2, %p3936_p1 }
0x1e8b   :  { %v2828_v58 = vsel %vm2827_vm12, %v2823_v56, %v2825_v57 }
0x1e8c   :  { %v2831_v59 = vsel %vm163_vm2, %v2828_v58, 0.0  ;;  %3727 = vmatpush3.bf16.msra.mxu0 %v3726_v0  ;;  %p3939_p4 = pnand %p3938_p3, %p3932_p0 }
0x1e8d   :  { %2832 = vadd.xlane.f32.xlu0 %v2831_v59 }
0x1f1a   :  { %v2833_v61 = vpop.xlane.xlu0 %2832 }
0x1f1b   :  { %v2834_v6 = vmul.f32 0.03125, %v2833_v61 }
0x1f1d   :  { %v2835_v52 = vsub.f32 %v2828_v58, %v2834_v6 }
0x1f1f   :  { %v2836_v62 = vmul.f32 %v2835_v52, %v2835_v52 }
0x1f21   :  { %v2837_v53 = vsel %vm163_vm2, %v2836_v62, 0.0 }
0x1f22   :  { %2838 = vadd.xlane.f32.xlu1 %v2837_v53 }
0x1faf   :  { %v2839_v1 = vpop.xlane.xlu1 %2838 }
0x1fb0   :  { %v2840_v7 = vmul.f32 0.03125, %v2839_v1 }
0x1fb2   :  { %v2841_v32 = vadd.f32 1e-05, %v2840_v7 }
0x1fb4   :  { %3927 = vrsqrt.f32 %v2841_v32 }
0x1fbe   :  { %v3928_v8 = vpop.eup %3927 }
0x1fbf   :  { %v2843_v9 = vmul.f32 %v3928_v8, %v2835_v52 }
0x1fc1   :  { %v2848_v13 = vmul.f32 %v3075_v3, %v2843_v9 }
0x1fc3   :  { %v2853_v12 = vadd.f32 %v3076_v11, %v2848_v13 }
0x1fc5   :  { %3476 = vmatmul.mubr.msk.f32.vlgmr.msra.gmra.mrb[28].mxu0 %vm159_vm1, %v2853_v12 }
0x2098   :  { %v2927_v43 = vpop.f32.mrb[28].mxu0 }
0x2099   :  { %2932 = vst.msk [vmem:[#allocation2] sm:$0x3] %vm2931_vm14, %v2927_v43  ;;  %v3477_v44 = vpop.f32.mrb[29].mxu0 }
0x209a   :  { %3942 = shalt.err (!%p3939_p4)
}
0x209b   :  { %s3943_s9 = scalar_lea.hbm %s4775_s13, 32 }
0x209c   :  { %p3944_p5 = scmp.ne.s32.totalorder %s4775_s13, %s3943_s9  ;;  %p3947_p6 = scmp.lt.u32.totalorder %s3943_s9, %s4775_s13 }
0x209e   :  { %p3949_p7 = pnand %p3947_p6, %p3944_p5 }
0x20a0   :  { %3952 = shalt.err (!%p3949_p7)
}
0x20a1   :  { %2942 = dma.vmem_to_hbm [thread:$0]  %s2940_s17, 32, %s4775_s13, [#allocation3]  }
0x20a2   :  { %3953 = dma.done.wait [#allocation3], 32  }
0x20a3   :  { %3954 = vsyncadd [#allocation3], 4294967264 }
0x20a4   :  { %2946 = vsyncpa [#allocation3], 1 }

</bundles_post_ra>
